<compile_context>
chip_gen: v7x
topology: tpu7x:2x2x1
jax: 0.10.0
libtpu: 0.0.40
codegen_flags: <defaults>
</compile_context>

<pallas_src>
import functools

import jax
import jax.numpy as jnp
from jax.experimental import pallas as pl
from jax.experimental.pallas import tpu as pltpu


# ----------------------------- math helpers -----------------------------

def _layer_norm(x, w, b, eps=1e-5):
    # nn.LayerNorm semantics: biased variance over the last dim, eps=1e-5.
    mu = jnp.mean(x, axis=-1, keepdims=True)
    var = jnp.mean((x - mu) ** 2, axis=-1, keepdims=True)
    return (x - mu) * jax.lax.rsqrt(var + eps) * w + b


# Abramowitz & Stegun 7.1.26 erf approximation (|err| <= 1.5e-7).  Built only
# from abs/exp/mul/add/where, which all have guaranteed Mosaic lowerings
# (lax.erf itself may not); numerically matches nn.GELU's exact erf default to
# ~1e-7.
_EA1, _EA2, _EA3, _EA4, _EA5 = (0.254829592, -0.284496736, 1.421413741,
                                -1.453152027, 1.061405429)
_EP = 0.3275911


def _erf_approx(x):
    a = jnp.abs(x)
    t = 1.0 / (1.0 + _EP * a)
    poly = ((((_EA5 * t + _EA4) * t + _EA3) * t + _EA2) * t + _EA1) * t
    e = 1.0 - poly * jnp.exp(-a * a)
    return jnp.where(x < 0.0, -e, e)


def _gelu_exact(x):
    # exact (erf-based) GELU, matching nn.GELU default
    return 0.5 * x * (1.0 + _erf_approx(x * 0.7071067811865476))


# ------------------------------ fused kernel -----------------------------

def vit_fused_kernel(patches_ref, pw_ref, pb_ref, pos_ref,
                     ln1w_ref, ln1b_ref, wqkv_ref, wo_ref, bo_ref,
                     ln2w_ref, ln2b_ref, w1_ref, b1_ref, w2_ref, b2_ref,
                     flnw_ref, flnb_ref,
                     out_ref, *, num_heads):
    """Grid = (batch_blocks, num_layers): one full transformer layer per step.

    The f32 residual stream is carried in out_ref itself: its block index is
    constant over the layer axis, so the block stays VMEM-resident across all
    layers and is only written back to HBM once, after the final LayerNorm.
    """
    layer = pl.program_id(1)
    n_layers = pl.num_programs(1)
    Bb, N, D = out_ref.shape
    hd = D // num_heads

    # ---- layer 0: patch embedding (conv-as-matmul) + positional embedding ----
    @pl.when(layer == 0)
    def _():
        K = patches_ref.shape[2]
        p = patches_ref[...].reshape(Bb * N, K)                      # bf16
        y = jnp.dot(p, pw_ref[...], preferred_element_type=jnp.float32)
        y = y + pb_ref[...]                                          # conv bias
        out_ref[...] = y.reshape(Bb, N, D) + pos_ref[...]

    x2 = out_ref[...].reshape(Bb * N, D)                             # f32 residual

    # ---- attention branch: x + (sum_h head_h @ Wo_h) + bo ----
    h = _layer_norm(x2, ln1w_ref[0], ln1b_ref[0]).astype(jnp.bfloat16)
    qkv = jnp.dot(h, wqkv_ref[0], preferred_element_type=jnp.float32)
    qkv = qkv.astype(jnp.bfloat16).reshape(Bb, N, 3 * D)             # cast once
    attn = jnp.zeros((Bb * N, D), jnp.float32)
    # TODO(synk): replace the static per-head loop with a heads-batched
    # dot_general once the (b,n,h,d)->(b*h,n,d) relayout is cheap/lowerable in
    # Mosaic; accumulating each head straight into the Wo projection below
    # already removes the nh-way lane concat the previous version paid for.
    for hh in range(num_heads):
        q = qkv[:, :, hh * hd:(hh + 1) * hd]                         # Wq pre-scaled
        k = qkv[:, :, D + hh * hd:D + (hh + 1) * hd]
        v = qkv[:, :, 2 * D + hh * hd:2 * D + (hh + 1) * hd]
        s = jnp.einsum("bqd,bkd->bqk", q, k, preferred_element_type=jnp.float32)
        s = s - jnp.max(s, axis=-1, keepdims=True)
        p = jnp.exp(s)
        p = p * pl.reciprocal(jnp.sum(p, axis=-1, keepdims=True), approx=True)
        o = jnp.einsum("bqk,bkd->bqd", p.astype(jnp.bfloat16), v,
                       preferred_element_type=jnp.float32)
        attn = attn + jnp.dot(o.reshape(Bb * N, hd).astype(jnp.bfloat16),
                              wo_ref[0, hh * hd:(hh + 1) * hd, :],
                              preferred_element_type=jnp.float32)
    x2 = x2 + attn + bo_ref[0]

    # ---- MLP branch: x + W2(GELU(W1(LN2(x)))) ----
    h2 = _layer_norm(x2, ln2w_ref[0], ln2b_ref[0]).astype(jnp.bfloat16)
    m = jnp.dot(h2, w1_ref[0], preferred_element_type=jnp.float32) + b1_ref[0]
    m = _gelu_exact(m)
    m = jnp.dot(m.astype(jnp.bfloat16), w2_ref[0],
                preferred_element_type=jnp.float32) + b2_ref[0]
    x2 = x2 + m

    # ---- write back into the resident output block ----
    @pl.when(layer < n_layers - 1)
    def _():
        out_ref[...] = x2.reshape(Bb, N, D)

    @pl.when(layer == n_layers - 1)
    def _():   # final LayerNorm, applied in place on the last layer
        y = _layer_norm(x2, flnw_ref[...], flnb_ref[...])
        out_ref[...] = y.reshape(Bb, N, D).astype(out_ref.dtype)


# ------------------------- per-chip tuning helpers ---------------------------

def _tpu_info():
    try:
        return pltpu.get_tpu_info()
    except Exception:
        return None


def _vmem_limit_bytes(frac=0.85):
    # ~85% of physical VMEM: ≈54 MiB on v7x (64 MiB), ≈108 MiB on v5e/v6e
    # (128 MiB); leaves headroom for Mosaic internal scratch.
    info = _tpu_info()
    cap = getattr(info, "vmem_capacity_bytes", None) if info is not None else None
    if not cap:
        cap = 64 * 1024 * 1024      # conservative fallback (v7x per-core VMEM)
    return int(cap * frac)


def _num_tensorcores():
    info = _tpu_info()
    if info is not None:
        for name in ("num_cores", "core_count", "num_tensorcores"):
            v = getattr(info, name, None)
            if v:
                return int(v)
    return 1


# ------------------------------ pallas wrapper -----------------------------

def vit_fused_forward(patches, prep, *, num_heads, batch_block=None):
    B, N, K = patches.shape
    D = prep["patch_w"].shape[-1]
    L, _, mlp = prep["w1"].shape
    assert D % num_heads == 0
    if batch_block is None:
        # Give each TensorCore its own batch block on multi-core parts (v7x);
        # on single-core chips keep the whole batch in one resident block so
        # per-layer weights are streamed exactly once.
        cores = _num_tensorcores()
        batch_block = B // cores if (cores > 1 and B % cores == 0) else B
    assert B % batch_block == 0
    nb = B // batch_block
    Bb = batch_block

    def inv(shape):              # grid-invariant: DMA'd once, stays in VMEM
        nd = len(shape)
        return pl.BlockSpec(shape, lambda b, l: (0,) * nd)

    def per_layer(shape):        # stacked (L, ...) weights streamed over layer axis
        nd = len(shape)
        # NOTE: if a v6e/v5e profile shows exposed weight DMA at small Bb, add
        # pipeline_mode=pl.Buffered(3) here for wqkv/w1/w2 (do NOT on v7x: no
        # VMEM headroom at 64 MiB).
        return pl.BlockSpec((1, *shape), lambda b, l: (l,) + (0,) * nd)

    kernel = functools.partial(vit_fused_kernel, num_heads=num_heads)
    return pl.pallas_call(
        kernel,
        out_shape=jax.ShapeDtypeStruct((B, N, D), jnp.float32),
        grid=(nb, L),
        in_specs=[
            # TODO(synk): the patches block is only consumed at layer 0 but is
            # held resident across all L steps; give patch-embed its own grid
            # phase if VMEM gets tight at real ViT sizes (it is bf16 already).
            pl.BlockSpec((Bb, N, K), lambda b, l: (b, 0, 0)),     # patches (bf16)
            inv((K, D)), inv((1, D)), inv((N, D)),                # patch_w, patch_b, pos
            per_layer((1, D)), per_layer((1, D)),                 # ln1 w, b
            per_layer((D, 3 * D)),                                # wqkv (q pre-scaled)
            per_layer((D, D)), per_layer((1, D)),                 # wo, bo
            per_layer((1, D)), per_layer((1, D)),                 # ln2 w, b
            per_layer((D, mlp)), per_layer((1, mlp)),             # w1, b1
            per_layer((mlp, D)), per_layer((1, D)),               # w2, b2
            inv((1, D)), inv((1, D)),                             # final LN w, b
        ],
        out_specs=pl.BlockSpec((Bb, N, D), lambda b, l: (b, 0, 0)),
        compiler_params=pltpu.CompilerParams(
            # batch-block axis is "parallel" (extent >= 2 on multi-TC parts);
            # the layer axis carries the resident residual stream and the
            # streamed weights, so it must stay "arbitrary".
            dimension_semantics=("parallel", "arbitrary"),
            vmem_limit_bytes=_vmem_limit_bytes()),
    )(patches, prep["patch_w"], prep["patch_b"], prep["pos"],
      prep["ln1_w"], prep["ln1_b"], prep["wqkv"], prep["wo"], prep["bo"],
      prep["ln2_w"], prep["ln2_b"], prep["w1"], prep["b1"], prep["w2"], prep["b2"],
      prep["final_ln_w"], prep["final_ln_b"])


# ------------------------------ glue (plain JAX) ----------------------------

def extract_patches(x, patch):
    # x: (B, C, H, W) NCHW -> (B, N, C*p*p), matching Conv2d(kernel=stride=p)
    # followed by flatten(2).transpose(1,2) (row-major patch order).
    B, C, H, W = x.shape
    Hp, Wp = H // patch, W // patch
    x = x.reshape(B, C, Hp, patch, Wp, patch)
    x = x.transpose(0, 2, 4, 1, 3, 5)          # (B, Hp, Wp, C, p, p)
    return x.reshape(B, Hp * Wp, C * patch * patch)


def init_params(key, in_channels, patch, hidden, mlp_dim, num_layers, n_patches):
    K = in_channels * patch * patch
    keys = jax.random.split(key, 3 + 6 * num_layers)
    ki = iter(keys)
    s = 0.02
    params = {
        "patch_w": s * jax.random.normal(next(ki), (K, hidden), jnp.float32),
        "patch_b": s * jax.random.normal(next(ki), (1, hidden), jnp.float32),
        "pos": s * jax.random.normal(next(ki), (n_patches, hidden), jnp.float32),
        "final_ln_w": jnp.ones((1, hidden), jnp.float32),
        "final_ln_b": jnp.zeros((1, hidden), jnp.float32),
        "blocks": [],
    }
    for _ in range(num_layers):
        blk = {
            "ln1_w": jnp.ones((1, hidden), jnp.float32),
            "ln1_b": jnp.zeros((1, hidden), jnp.float32),
            # fused qkv Linear (qkv_bias=False); columns laid out [q | k | v],
            # head-major then head_dim, matching MONAI SABlock's rearrange.
            "wqkv": s * jax.random.normal(next(ki), (hidden, 3 * hidden), jnp.float32),
            "wo": s * jax.random.normal(next(ki), (hidden, hidden), jnp.float32),
            "bo": s * jax.random.normal(next(ki), (1, hidden), jnp.float32),
            "ln2_w": jnp.ones((1, hidden), jnp.float32),
            "ln2_b": jnp.zeros((1, hidden), jnp.float32),
            "w1": s * jax.random.normal(next(ki), (hidden, mlp_dim), jnp.float32),
            "b1": s * jax.random.normal(next(ki), (1, mlp_dim), jnp.float32),
            "w2": s * jax.random.normal(next(ki), (mlp_dim, hidden), jnp.float32),
            "b2": jnp.zeros((1, hidden), jnp.float32),
        }
        params["blocks"].append(blk)
    return params


def prepare_params(params, num_heads):
    """Stack per-layer weights along a leading L axis (streamed over the layer
    grid axis), cast matmul weights to bf16, and fold the 1/sqrt(head_dim)
    attention scale into the q-columns of the fused qkv weight
    (mathematically identical: (q*s) @ k^T == (q @ k^T) * s)."""
    D = params["patch_w"].shape[-1]
    hd = D // num_heads
    scale = 1.0 / (hd ** 0.5)

    def stack(key):
        return jnp.stack([blk[key] for blk in params["blocks"]], axis=0)

    wqkv = stack("wqkv")
    wqkv = wqkv.at[:, :, :D].multiply(scale)
    return {
        "patch_w": params["patch_w"].astype(jnp.bfloat16),
        "patch_b": params["patch_b"],
        "pos": params["pos"],
        "ln1_w": stack("ln1_w"), "ln1_b": stack("ln1_b"),
        "wqkv": wqkv.astype(jnp.bfloat16),
        "wo": stack("wo").astype(jnp.bfloat16), "bo": stack("bo"),
        "ln2_w": stack("ln2_w"), "ln2_b": stack("ln2_b"),
        "w1": stack("w1").astype(jnp.bfloat16), "b1": stack("b1"),
        "w2": stack("w2").astype(jnp.bfloat16), "b2": stack("b2"),
        "final_ln_w": params["final_ln_w"], "final_ln_b": params["final_ln_b"],
    }


def vit_forward(x, prep, *, patch, num_heads, batch_block=None):
    # TODO(synk): cls_token / classification head (classification=True) and the
    # 'resnet10'/'resnet50' projection paths are disabled in this config.
    # im2col left to XLA (tiny, layout-only); cast to bf16 here so the resident
    # patches block and its HBM DMA are half-size (the kernel consumes bf16).
    patches = extract_patches(x, patch).astype(jnp.bfloat16)
    return vit_fused_forward(patches, prep, num_heads=num_heads,
                             batch_block=batch_block)


# ----------------------------------- main -----------------------------------

if __name__ == "__main__":
    B, C, H, W = 2, 4, 16, 16
    patch = 4
    hidden, mlp_dim = 32, 64
    num_layers, num_heads = 2, 4
    n_patches = (H // patch) * (W // patch)    # 16 tokens

    key = jax.random.PRNGKey(0)
    kx, kp = jax.random.split(key)
    x = jax.random.normal(kx, (B, C, H, W), jnp.float32)       # NCHW input
    params = init_params(kp, C, patch, hidden, mlp_dim, num_layers, n_patches)
    prep = prepare_params(params, num_heads)                   # stack/cast/fold once

    fwd = jax.jit(functools.partial(vit_forward, patch=patch, num_heads=num_heads))
    out = fwd(x, prep)                                         # (B, N, hidden)
    jax.block_until_ready(out)
    assert out.shape == (B, n_patches, hidden)
    print("KERNEL_OK")
</pallas_src>

<mosaic_0001>
module attributes {stable_mosaic.version = 11 : i64} {
  func.func @vit_fused_kernel(%arg0: i32, %arg1: i32, %arg2: memref<2x16x64xbf16, #tpu.memory_space<vmem>>, %arg3: memref<64x32xbf16, #tpu.memory_space<vmem>>, %arg4: memref<1x32xf32, #tpu.memory_space<vmem>>, %arg5: memref<16x32xf32, #tpu.memory_space<vmem>>, %arg6: memref<1x1x32xf32, #tpu.memory_space<vmem>>, %arg7: memref<1x1x32xf32, #tpu.memory_space<vmem>>, %arg8: memref<1x32x96xbf16, #tpu.memory_space<vmem>>, %arg9: memref<1x32x32xbf16, #tpu.memory_space<vmem>>, %arg10: memref<1x1x32xf32, #tpu.memory_space<vmem>>, %arg11: memref<1x1x32xf32, #tpu.memory_space<vmem>>, %arg12: memref<1x1x32xf32, #tpu.memory_space<vmem>>, %arg13: memref<1x32x64xbf16, #tpu.memory_space<vmem>>, %arg14: memref<1x1x64xf32, #tpu.memory_space<vmem>>, %arg15: memref<1x64x32xbf16, #tpu.memory_space<vmem>>, %arg16: memref<1x1x32xf32, #tpu.memory_space<vmem>>, %arg17: memref<1x32xf32, #tpu.memory_space<vmem>>, %arg18: memref<1x32xf32, #tpu.memory_space<vmem>>, %arg19: memref<2x16x32xf32, #tpu.memory_space<vmem>>) attributes {dimension_semantics = [#tpu.dimension_semantics<parallel>, #tpu.dimension_semantics<arbitrary>], iteration_bounds = array<i64: 1, 2>, scalar_prefetch = 0 : i64, scratch_operands = 0 : i64, tpu.core_type = #tpu.core_type<tc>, window_params = [{transform_indices = @transform_0, window_bounds = array<i64: 2, 16, 64>}, {pipeline_mode = #tpu.pipeline_mode<synchronous>, transform_indices = @transform_1, window_bounds = array<i64: 64, 32>}, {pipeline_mode = #tpu.pipeline_mode<synchronous>, transform_indices = @transform_2, window_bounds = array<i64: 1, 32>}, {pipeline_mode = #tpu.pipeline_mode<synchronous>, transform_indices = @transform_3, window_bounds = array<i64: 16, 32>}, {transform_indices = @transform_4, window_bounds = array<i64: 1, 1, 32>}, {transform_indices = @transform_5, window_bounds = array<i64: 1, 1, 32>}, {transform_indices = @transform_6, window_bounds = array<i64: 1, 32, 96>}, {transform_indices = @transform_7, window_bounds = array<i64: 1, 32, 32>}, {transform_indices = @transform_8, window_bounds = array<i64: 1, 1, 32>}, {transform_indices = @transform_9, window_bounds = array<i64: 1, 1, 32>}, {transform_indices = @transform_10, window_bounds = array<i64: 1, 1, 32>}, {transform_indices = @transform_11, window_bounds = array<i64: 1, 32, 64>}, {transform_indices = @transform_12, window_bounds = array<i64: 1, 1, 64>}, {transform_indices = @transform_13, window_bounds = array<i64: 1, 64, 32>}, {transform_indices = @transform_14, window_bounds = array<i64: 1, 1, 32>}, {pipeline_mode = #tpu.pipeline_mode<synchronous>, transform_indices = @transform_15, window_bounds = array<i64: 1, 32>}, {pipeline_mode = #tpu.pipeline_mode<synchronous>, transform_indices = @transform_16, window_bounds = array<i64: 1, 32>}, {transform_indices = @transform_17, window_bounds = array<i64: 2, 16, 32>}]} {
    %c0_i32 = arith.constant 0 : i32
    %0 = arith.cmpi eq, %arg1, %c0_i32 : i32
    %1 = arith.extui %0 : i1 to i32
    %c0_i32_0 = arith.constant 0 : i32
    %2 = arith.cmpi ne, %1, %c0_i32_0 : i32
    scf.if %2 {
      %c0_93 = arith.constant 0 : index
      %c0_94 = arith.constant 0 : index
      %c0_95 = arith.constant 0 : index
      %220 = vector.load %arg2[%c0_93, %c0_94, %c0_95] : memref<2x16x64xbf16, #tpu.memory_space<vmem>>, vector<2x16x64xbf16>
      %221 = vector.shape_cast %220 : vector<2x16x64xbf16> to vector<32x64xbf16>
      %c0_96 = arith.constant 0 : index
      %c0_97 = arith.constant 0 : index
      %222 = vector.load %arg3[%c0_96, %c0_97] : memref<64x32xbf16, #tpu.memory_space<vmem>>, vector<64x32xbf16>
      %cst_98 = arith.constant dense<0.000000e+00> : vector<32x32xf32>
      %223 = tpu.matmul %221, %222, %cst_98 {dimension_numbers = #tpu.dot_dimension_numbers<[1], [0], [0], [1], [0, 0, 1, 1], [], []>} : vector<32x64xbf16>, vector<64x32xbf16>, vector<32x32xf32> -> vector<32x32xf32>
      %c0_99 = arith.constant 0 : index
      %c0_100 = arith.constant 0 : index
      %224 = vector.load %arg4[%c0_99, %c0_100] : memref<1x32xf32, #tpu.memory_space<vmem>>, vector<1x32xf32>
      %225 = vector.broadcast %224 : vector<1x32xf32> to vector<32x32xf32>
      %226 = arith.addf %223, %225 : vector<32x32xf32>
      %227 = vector.shape_cast %226 : vector<32x32xf32> to vector<2x16x32xf32>
      %c0_101 = arith.constant 0 : index
      %c0_102 = arith.constant 0 : index
      %228 = vector.load %arg5[%c0_101, %c0_102] : memref<16x32xf32, #tpu.memory_space<vmem>>, vector<16x32xf32>
      %229 = vector.shape_cast %228 : vector<16x32xf32> to vector<1x16x32xf32>
      %230 = vector.broadcast %229 : vector<1x16x32xf32> to vector<2x16x32xf32>
      %231 = arith.addf %227, %230 : vector<2x16x32xf32>
      %c0_103 = arith.constant 0 : index
      %c0_104 = arith.constant 0 : index
      %c0_105 = arith.constant 0 : index
      %232 = vector.load %arg19[%c0_103, %c0_104, %c0_105] : memref<2x16x32xf32, #tpu.memory_space<vmem>>, vector<2x16x32xf32>
      tpu.vector_store %arg19[%c0_103, %c0_104, %c0_105], %231 {strides = array<i32>} : memref<2x16x32xf32, #tpu.memory_space<vmem>>, vector<2x16x32xf32>,
    } else {
    }
    %c0 = arith.constant 0 : index
    %c0_1 = arith.constant 0 : index
    %c0_2 = arith.constant 0 : index
    %3 = vector.load %arg19[%c0, %c0_1, %c0_2] : memref<2x16x32xf32, #tpu.memory_space<vmem>>, vector<2x16x32xf32>
    %4 = vector.shape_cast %3 : vector<2x16x32xf32> to vector<32x32xf32>
    %c0_3 = arith.constant 0 : index
    %c0_4 = arith.constant 0 : index
    %c0_5 = arith.constant 0 : index
    %5 = vector.load %arg6[%c0_3, %c0_4, %c0_5] : memref<1x1x32xf32, #tpu.memory_space<vmem>>, vector<1x1x32xf32>
    %6 = vector.shape_cast %5 : vector<1x1x32xf32> to vector<1x32xf32>
    %c0_6 = arith.constant 0 : index
    %c0_7 = arith.constant 0 : index
    %c0_8 = arith.constant 0 : index
    %7 = vector.load %arg7[%c0_6, %c0_7, %c0_8] : memref<1x1x32xf32, #tpu.memory_space<vmem>>, vector<1x1x32xf32>
    %8 = vector.shape_cast %7 : vector<1x1x32xf32> to vector<1x32xf32>
    %cst = arith.constant dense<0.000000e+00> : vector<32xf32>
    %9 = vector.multi_reduction <add>, %4, %cst [1] : vector<32x32xf32> to vector<32xf32>
    %10 = vector.shape_cast %9 : vector<32xf32> to vector<32x1xf32>
    %cst_9 = arith.constant 3.200000e+01 : f32
    %11 = vector.broadcast %cst_9 : f32 to vector<32x1xf32>
    %12 = arith.divf %10, %11 : vector<32x1xf32>
    %13 = vector.broadcast %12 : vector<32x1xf32> to vector<32x32xf32>
    %14 = arith.subf %4, %13 : vector<32x32xf32>
    %15 = arith.mulf %14, %14 : vector<32x32xf32>
    %cst_10 = arith.constant dense<0.000000e+00> : vector<32xf32>
    %16 = vector.multi_reduction <add>, %15, %cst_10 [1] : vector<32x32xf32> to vector<32xf32>
    %17 = vector.shape_cast %16 : vector<32xf32> to vector<32x1xf32>
    %cst_11 = arith.constant 3.200000e+01 : f32
    %18 = vector.broadcast %cst_11 : f32 to vector<32x1xf32>
    %19 = arith.divf %17, %18 : vector<32x1xf32>
    %20 = vector.broadcast %12 : vector<32x1xf32> to vector<32x32xf32>
    %21 = arith.subf %4, %20 : vector<32x32xf32>
    %cst_12 = arith.constant 9.99999974E-6 : f32
    %22 = vector.broadcast %cst_12 : f32 to vector<32x1xf32>
    %23 = arith.addf %19, %22 : vector<32x1xf32>
    %24 = math.rsqrt %23 : vector<32x1xf32>
    %25 = vector.broadcast %24 : vector<32x1xf32> to vector<32x32xf32>
    %26 = arith.mulf %21, %25 : vector<32x32xf32>
    %27 = vector.broadcast %6 : vector<1x32xf32> to vector<32x32xf32>
    %28 = arith.mulf %26, %27 : vector<32x32xf32>
    %29 = vector.broadcast %8 : vector<1x32xf32> to vector<32x32xf32>
    %30 = arith.addf %28, %29 : vector<32x32xf32>
    %31 = arith.truncf %30 : vector<32x32xf32> to vector<32x32xbf16>
    %c0_13 = arith.constant 0 : index
    %c0_14 = arith.constant 0 : index
    %c0_15 = arith.constant 0 : index
    %32 = vector.load %arg8[%c0_13, %c0_14, %c0_15] : memref<1x32x96xbf16, #tpu.memory_space<vmem>>, vector<1x32x96xbf16>
    %33 = vector.shape_cast %32 : vector<1x32x96xbf16> to vector<32x96xbf16>
    %cst_16 = arith.constant dense<0.000000e+00> : vector<32x96xf32>
    %34 = tpu.matmul %31, %33, %cst_16 {dimension_numbers = #tpu.dot_dimension_numbers<[1], [0], [0], [1], [0, 0, 1, 1], [], []>} : vector<32x32xbf16>, vector<32x96xbf16>, vector<32x96xf32> -> vector<32x96xf32>
    %35 = arith.truncf %34 : vector<32x96xf32> to vector<32x96xbf16>
    %36 = vector.shape_cast %35 : vector<32x96xbf16> to vector<2x16x96xbf16>
    %cst_17 = arith.constant 0.000000e+00 : f32
    %37 = vector.broadcast %cst_17 : f32 to vector<32x32xf32>
    %38 = vector.extract_strided_slice %36 {offsets = [0, 0, 0], sizes = [2, 16, 8], strides = [1, 1, 1]} : vector<2x16x96xbf16> to vector<2x16x8xbf16>
    %39 = vector.extract_strided_slice %36 {offsets = [0, 0, 32], sizes = [2, 16, 8], strides = [1, 1, 1]} : vector<2x16x96xbf16> to vector<2x16x8xbf16>
    %40 = vector.extract_strided_slice %36 {offsets = [0, 0, 64], sizes = [2, 16, 8], strides = [1, 1, 1]} : vector<2x16x96xbf16> to vector<2x16x8xbf16>
    "tpu.trace_start"() <{level = 10 : i32, message = "bqd,bkd->bqk"}> : () -> ()
    %cst_18 = arith.constant dense<0.000000e+00> : vector<2x16x16xf32>
    %41 = tpu.matmul %38, %39, %cst_18 {dimension_numbers = #tpu.dot_dimension_numbers<[2], [2], [1], [1], [0, 0, 0, 1, 1, 1], [0], [0]>} : vector<2x16x8xbf16>, vector<2x16x8xbf16>, vector<2x16x16xf32> -> vector<2x16x16xf32>
    "tpu.trace_stop"() : () -> ()
    %cst_19 = arith.constant dense<0xFF800000> : vector<2x16xf32>
    %42 = vector.multi_reduction <maximumf>, %41, %cst_19 [2] : vector<2x16x16xf32> to vector<2x16xf32>
    %43 = vector.shape_cast %42 : vector<2x16xf32> to vector<2x16x1xf32>
    %44 = vector.broadcast %43 : vector<2x16x1xf32> to vector<2x16x16xf32>
    %45 = arith.subf %41, %44 : vector<2x16x16xf32>
    %46 = math.exp %45 : vector<2x16x16xf32>
    %cst_20 = arith.constant dense<0.000000e+00> : vector<2x16xf32>
    %47 = vector.multi_reduction <add>, %46, %cst_20 [2] : vector<2x16x16xf32> to vector<2x16xf32>
    %48 = vector.shape_cast %47 : vector<2x16xf32> to vector<2x16x1xf32>
    %49 = tpu.reciprocal %48 {approx = true} : vector<2x16x1xf32> -> vector<2x16x1xf32>
    %50 = vector.broadcast %49 : vector<2x16x1xf32> to vector<2x16x16xf32>
    %51 = arith.mulf %46, %50 : vector<2x16x16xf32>
    %52 = arith.truncf %51 : vector<2x16x16xf32> to vector<2x16x16xbf16>
    "tpu.trace_start"() <{level = 10 : i32, message = "bqk,bkd->bqd"}> : () -> ()
    %cst_21 = arith.constant dense<0.000000e+00> : vector<2x16x8xf32>
    %53 = tpu.matmul %52, %40, %cst_21 {dimension_numbers = #tpu.dot_dimension_numbers<[2], [1], [1], [2], [0, 0, 0, 1, 1, 2], [0], [0]>} : vector<2x16x16xbf16>, vector<2x16x8xbf16>, vector<2x16x8xf32> -> vector<2x16x8xf32>
    "tpu.trace_stop"() : () -> ()
    %54 = vector.shape_cast %53 : vector<2x16x8xf32> to vector<32x8xf32>
    %55 = arith.truncf %54 : vector<32x8xf32> to vector<32x8xbf16>
    %c0_22 = arith.constant 0 : index
    %c0_23 = arith.constant 0 : index
    %c0_24 = arith.constant 0 : index
    %56 = vector.load %arg9[%c0_22, %c0_23, %c0_24] : memref<1x32x32xbf16, #tpu.memory_space<vmem>>, vector<1x8x32xbf16>
    %57 = vector.shape_cast %56 : vector<1x8x32xbf16> to vector<8x32xbf16>
    %cst_25 = arith.constant dense<0.000000e+00> : vector<32x32xf32>
    %58 = tpu.matmul %55, %57, %cst_25 {dimension_numbers = #tpu.dot_dimension_numbers<[1], [0], [0], [1], [0, 0, 1, 1], [], []>} : vector<32x8xbf16>, vector<8x32xbf16>, vector<32x32xf32> -> vector<32x32xf32>
    %59 = arith.addf %37, %58 : vector<32x32xf32>
    %60 = vector.extract_strided_slice %36 {offsets = [0, 0, 8], sizes = [2, 16, 8], strides = [1, 1, 1]} : vector<2x16x96xbf16> to vector<2x16x8xbf16>
    %61 = vector.extract_strided_slice %36 {offsets = [0, 0, 40], sizes = [2, 16, 8], strides = [1, 1, 1]} : vector<2x16x96xbf16> to vector<2x16x8xbf16>
    %62 = vector.extract_strided_slice %36 {offsets = [0, 0, 72], sizes = [2, 16, 8], strides = [1, 1, 1]} : vector<2x16x96xbf16> to vector<2x16x8xbf16>
    "tpu.trace_start"() <{level = 10 : i32, message = "bqd,bkd->bqk"}> : () -> ()
    %cst_26 = arith.constant dense<0.000000e+00> : vector<2x16x16xf32>
    %63 = tpu.matmul %60, %61, %cst_26 {dimension_numbers = #tpu.dot_dimension_numbers<[2], [2], [1], [1], [0, 0, 0, 1, 1, 1], [0], [0]>} : vector<2x16x8xbf16>, vector<2x16x8xbf16>, vector<2x16x16xf32> -> vector<2x16x16xf32>
    "tpu.trace_stop"() : () -> ()
    %cst_27 = arith.constant dense<0xFF800000> : vector<2x16xf32>
    %64 = vector.multi_reduction <maximumf>, %63, %cst_27 [2] : vector<2x16x16xf32> to vector<2x16xf32>
    %65 = vector.shape_cast %64 : vector<2x16xf32> to vector<2x16x1xf32>
    %66 = vector.broadcast %65 : vector<2x16x1xf32> to vector<2x16x16xf32>
    %67 = arith.subf %63, %66 : vector<2x16x16xf32>
    %68 = math.exp %67 : vector<2x16x16xf32>
    %cst_28 = arith.constant dense<0.000000e+00> : vector<2x16xf32>
    %69 = vector.multi_reduction <add>, %68, %cst_28 [2] : vector<2x16x16xf32> to vector<2x16xf32>
    %70 = vector.shape_cast %69 : vector<2x16xf32> to vector<2x16x1xf32>
    %71 = tpu.reciprocal %70 {approx = true} : vector<2x16x1xf32> -> vector<2x16x1xf32>
    %72 = vector.broadcast %71 : vector<2x16x1xf32> to vector<2x16x16xf32>
    %73 = arith.mulf %68, %72 : vector<2x16x16xf32>
    %74 = arith.truncf %73 : vector<2x16x16xf32> to vector<2x16x16xbf16>
    "tpu.trace_start"() <{level = 10 : i32, message = "bqk,bkd->bqd"}> : () -> ()
    %cst_29 = arith.constant dense<0.000000e+00> : vector<2x16x8xf32>
    %75 = tpu.matmul %74, %62, %cst_29 {dimension_numbers = #tpu.dot_dimension_numbers<[2], [1], [1], [2], [0, 0, 0, 1, 1, 2], [0], [0]>} : vector<2x16x16xbf16>, vector<2x16x8xbf16>, vector<2x16x8xf32> -> vector<2x16x8xf32>
    "tpu.trace_stop"() : () -> ()
    %76 = vector.shape_cast %75 : vector<2x16x8xf32> to vector<32x8xf32>
    %77 = arith.truncf %76 : vector<32x8xf32> to vector<32x8xbf16>
    %c0_30 = arith.constant 0 : index
    %c8 = arith.constant 8 : index
    %c0_31 = arith.constant 0 : index
    %78 = vector.load %arg9[%c0_30, %c8, %c0_31] : memref<1x32x32xbf16, #tpu.memory_space<vmem>>, vector<1x8x32xbf16>
    %79 = vector.shape_cast %78 : vector<1x8x32xbf16> to vector<8x32xbf16>
    %cst_32 = arith.constant dense<0.000000e+00> : vector<32x32xf32>
    %80 = tpu.matmul %77, %79, %cst_32 {dimension_numbers = #tpu.dot_dimension_numbers<[1], [0], [0], [1], [0, 0, 1, 1], [], []>} : vector<32x8xbf16>, vector<8x32xbf16>, vector<32x32xf32> -> vector<32x32xf32>
    %81 = arith.addf %59, %80 : vector<32x32xf32>
    %82 = vector.extract_strided_slice %36 {offsets = [0, 0, 16], sizes = [2, 16, 8], strides = [1, 1, 1]} : vector<2x16x96xbf16> to vector<2x16x8xbf16>
    %83 = vector.extract_strided_slice %36 {offsets = [0, 0, 48], sizes = [2, 16, 8], strides = [1, 1, 1]} : vector<2x16x96xbf16> to vector<2x16x8xbf16>
    %84 = vector.extract_strided_slice %36 {offsets = [0, 0, 80], sizes = [2, 16, 8], strides = [1, 1, 1]} : vector<2x16x96xbf16> to vector<2x16x8xbf16>
    "tpu.trace_start"() <{level = 10 : i32, message = "bqd,bkd->bqk"}> : () -> ()
    %cst_33 = arith.constant dense<0.000000e+00> : vector<2x16x16xf32>
    %85 = tpu.matmul %82, %83, %cst_33 {dimension_numbers = #tpu.dot_dimension_numbers<[2], [2], [1], [1], [0, 0, 0, 1, 1, 1], [0], [0]>} : vector<2x16x8xbf16>, vector<2x16x8xbf16>, vector<2x16x16xf32> -> vector<2x16x16xf32>
    "tpu.trace_stop"() : () -> ()
    %cst_34 = arith.constant dense<0xFF800000> : vector<2x16xf32>
    %86 = vector.multi_reduction <maximumf>, %85, %cst_34 [2] : vector<2x16x16xf32> to vector<2x16xf32>
    %87 = vector.shape_cast %86 : vector<2x16xf32> to vector<2x16x1xf32>
    %88 = vector.broadcast %87 : vector<2x16x1xf32> to vector<2x16x16xf32>
    %89 = arith.subf %85, %88 : vector<2x16x16xf32>
    %90 = math.exp %89 : vector<2x16x16xf32>
    %cst_35 = arith.constant dense<0.000000e+00> : vector<2x16xf32>
    %91 = vector.multi_reduction <add>, %90, %cst_35 [2] : vector<2x16x16xf32> to vector<2x16xf32>
    %92 = vector.shape_cast %91 : vector<2x16xf32> to vector<2x16x1xf32>
    %93 = tpu.reciprocal %92 {approx = true} : vector<2x16x1xf32> -> vector<2x16x1xf32>
    %94 = vector.broadcast %93 : vector<2x16x1xf32> to vector<2x16x16xf32>
    %95 = arith.mulf %90, %94 : vector<2x16x16xf32>
    %96 = arith.truncf %95 : vector<2x16x16xf32> to vector<2x16x16xbf16>
    "tpu.trace_start"() <{level = 10 : i32, message = "bqk,bkd->bqd"}> : () -> ()
    %cst_36 = arith.constant dense<0.000000e+00> : vector<2x16x8xf32>
    %97 = tpu.matmul %96, %84, %cst_36 {dimension_numbers = #tpu.dot_dimension_numbers<[2], [1], [1], [2], [0, 0, 0, 1, 1, 2], [0], [0]>} : vector<2x16x16xbf16>, vector<2x16x8xbf16>, vector<2x16x8xf32> -> vector<2x16x8xf32>
    "tpu.trace_stop"() : () -> ()
    %98 = vector.shape_cast %97 : vector<2x16x8xf32> to vector<32x8xf32>
    %99 = arith.truncf %98 : vector<32x8xf32> to vector<32x8xbf16>
    %c0_37 = arith.constant 0 : index
    %c16 = arith.constant 16 : index
    %c0_38 = arith.constant 0 : index
    %100 = vector.load %arg9[%c0_37, %c16, %c0_38] : memref<1x32x32xbf16, #tpu.memory_space<vmem>>, vector<1x8x32xbf16>
    %101 = vector.shape_cast %100 : vector<1x8x32xbf16> to vector<8x32xbf16>
    %cst_39 = arith.constant dense<0.000000e+00> : vector<32x32xf32>
    %102 = tpu.matmul %99, %101, %cst_39 {dimension_numbers = #tpu.dot_dimension_numbers<[1], [0], [0], [1], [0, 0, 1, 1], [], []>} : vector<32x8xbf16>, vector<8x32xbf16>, vector<32x32xf32> -> vector<32x32xf32>
    %103 = arith.addf %81, %102 : vector<32x32xf32>
    %104 = vector.extract_strided_slice %36 {offsets = [0, 0, 24], sizes = [2, 16, 8], strides = [1, 1, 1]} : vector<2x16x96xbf16> to vector<2x16x8xbf16>
    %105 = vector.extract_strided_slice %36 {offsets = [0, 0, 56], sizes = [2, 16, 8], strides = [1, 1, 1]} : vector<2x16x96xbf16> to vector<2x16x8xbf16>
    %106 = vector.extract_strided_slice %36 {offsets = [0, 0, 88], sizes = [2, 16, 8], strides = [1, 1, 1]} : vector<2x16x96xbf16> to vector<2x16x8xbf16>
    "tpu.trace_start"() <{level = 10 : i32, message = "bqd,bkd->bqk"}> : () -> ()
    %cst_40 = arith.constant dense<0.000000e+00> : vector<2x16x16xf32>
    %107 = tpu.matmul %104, %105, %cst_40 {dimension_numbers = #tpu.dot_dimension_numbers<[2], [2], [1], [1], [0, 0, 0, 1, 1, 1], [0], [0]>} : vector<2x16x8xbf16>, vector<2x16x8xbf16>, vector<2x16x16xf32> -> vector<2x16x16xf32>
    "tpu.trace_stop"() : () -> ()
    %cst_41 = arith.constant dense<0xFF800000> : vector<2x16xf32>
    %108 = vector.multi_reduction <maximumf>, %107, %cst_41 [2] : vector<2x16x16xf32> to vector<2x16xf32>
    %109 = vector.shape_cast %108 : vector<2x16xf32> to vector<2x16x1xf32>
    %110 = vector.broadcast %109 : vector<2x16x1xf32> to vector<2x16x16xf32>
    %111 = arith.subf %107, %110 : vector<2x16x16xf32>
    %112 = math.exp %111 : vector<2x16x16xf32>
    %cst_42 = arith.constant dense<0.000000e+00> : vector<2x16xf32>
    %113 = vector.multi_reduction <add>, %112, %cst_42 [2] : vector<2x16x16xf32> to vector<2x16xf32>
    %114 = vector.shape_cast %113 : vector<2x16xf32> to vector<2x16x1xf32>
    %115 = tpu.reciprocal %114 {approx = true} : vector<2x16x1xf32> -> vector<2x16x1xf32>
    %116 = vector.broadcast %115 : vector<2x16x1xf32> to vector<2x16x16xf32>
    %117 = arith.mulf %112, %116 : vector<2x16x16xf32>
    %118 = arith.truncf %117 : vector<2x16x16xf32> to vector<2x16x16xbf16>
    "tpu.trace_start"() <{level = 10 : i32, message = "bqk,bkd->bqd"}> : () -> ()
    %cst_43 = arith.constant dense<0.000000e+00> : vector<2x16x8xf32>
    %119 = tpu.matmul %118, %106, %cst_43 {dimension_numbers = #tpu.dot_dimension_numbers<[2], [1], [1], [2], [0, 0, 0, 1, 1, 2], [0], [0]>} : vector<2x16x16xbf16>, vector<2x16x8xbf16>, vector<2x16x8xf32> -> vector<2x16x8xf32>
    "tpu.trace_stop"() : () -> ()
    %120 = vector.shape_cast %119 : vector<2x16x8xf32> to vector<32x8xf32>
    %121 = arith.truncf %120 : vector<32x8xf32> to vector<32x8xbf16>
    %c0_44 = arith.constant 0 : index
    %c24 = arith.constant 24 : index
    %c0_45 = arith.constant 0 : index
    %122 = vector.load %arg9[%c0_44, %c24, %c0_45] : memref<1x32x32xbf16, #tpu.memory_space<vmem>>, vector<1x8x32xbf16>
    %123 = vector.shape_cast %122 : vector<1x8x32xbf16> to vector<8x32xbf16>
    %cst_46 = arith.constant dense<0.000000e+00> : vector<32x32xf32>
    %124 = tpu.matmul %121, %123, %cst_46 {dimension_numbers = #tpu.dot_dimension_numbers<[1], [0], [0], [1], [0, 0, 1, 1], [], []>} : vector<32x8xbf16>, vector<8x32xbf16>, vector<32x32xf32> -> vector<32x32xf32>
    %125 = arith.addf %103, %124 : vector<32x32xf32>
    %126 = arith.addf %4, %125 : vector<32x32xf32>
    %c0_47 = arith.constant 0 : index
    %c0_48 = arith.constant 0 : index
    %c0_49 = arith.constant 0 : index
    %127 = vector.load %arg10[%c0_47, %c0_48, %c0_49] : memref<1x1x32xf32, #tpu.memory_space<vmem>>, vector<1x1x32xf32>
    %128 = vector.shape_cast %127 : vector<1x1x32xf32> to vector<1x32xf32>
    %129 = vector.broadcast %128 : vector<1x32xf32> to vector<32x32xf32>
    %130 = arith.addf %126, %129 : vector<32x32xf32>
    %c0_50 = arith.constant 0 : index
    %c0_51 = arith.constant 0 : index
    %c0_52 = arith.constant 0 : index
    %131 = vector.load %arg11[%c0_50, %c0_51, %c0_52] : memref<1x1x32xf32, #tpu.memory_space<vmem>>, vector<1x1x32xf32>
    %132 = vector.shape_cast %131 : vector<1x1x32xf32> to vector<1x32xf32>
    %c0_53 = arith.constant 0 : index
    %c0_54 = arith.constant 0 : index
    %c0_55 = arith.constant 0 : index
    %133 = vector.load %arg12[%c0_53, %c0_54, %c0_55] : memref<1x1x32xf32, #tpu.memory_space<vmem>>, vector<1x1x32xf32>
    %134 = vector.shape_cast %133 : vector<1x1x32xf32> to vector<1x32xf32>
    %cst_56 = arith.constant dense<0.000000e+00> : vector<32xf32>
    %135 = vector.multi_reduction <add>, %130, %cst_56 [1] : vector<32x32xf32> to vector<32xf32>
    %136 = vector.shape_cast %135 : vector<32xf32> to vector<32x1xf32>
    %cst_57 = arith.constant 3.200000e+01 : f32
    %137 = vector.broadcast %cst_57 : f32 to vector<32x1xf32>
    %138 = arith.divf %136, %137 : vector<32x1xf32>
    %139 = vector.broadcast %138 : vector<32x1xf32> to vector<32x32xf32>
    %140 = arith.subf %130, %139 : vector<32x32xf32>
    %141 = arith.mulf %140, %140 : vector<32x32xf32>
    %cst_58 = arith.constant dense<0.000000e+00> : vector<32xf32>
    %142 = vector.multi_reduction <add>, %141, %cst_58 [1] : vector<32x32xf32> to vector<32xf32>
    %143 = vector.shape_cast %142 : vector<32xf32> to vector<32x1xf32>
    %cst_59 = arith.constant 3.200000e+01 : f32
    %144 = vector.broadcast %cst_59 : f32 to vector<32x1xf32>
    %145 = arith.divf %143, %144 : vector<32x1xf32>
    %146 = vector.broadcast %138 : vector<32x1xf32> to vector<32x32xf32>
    %147 = arith.subf %130, %146 : vector<32x32xf32>
    %cst_60 = arith.constant 9.99999974E-6 : f32
    %148 = vector.broadcast %cst_60 : f32 to vector<32x1xf32>
    %149 = arith.addf %145, %148 : vector<32x1xf32>
    %150 = math.rsqrt %149 : vector<32x1xf32>
    %151 = vector.broadcast %150 : vector<32x1xf32> to vector<32x32xf32>
    %152 = arith.mulf %147, %151 : vector<32x32xf32>
    %153 = vector.broadcast %132 : vector<1x32xf32> to vector<32x32xf32>
    %154 = arith.mulf %152, %153 : vector<32x32xf32>
    %155 = vector.broadcast %134 : vector<1x32xf32> to vector<32x32xf32>
    %156 = arith.addf %154, %155 : vector<32x32xf32>
    %157 = arith.truncf %156 : vector<32x32xf32> to vector<32x32xbf16>
    %c0_61 = arith.constant 0 : index
    %c0_62 = arith.constant 0 : index
    %c0_63 = arith.constant 0 : index
    %158 = vector.load %arg13[%c0_61, %c0_62, %c0_63] : memref<1x32x64xbf16, #tpu.memory_space<vmem>>, vector<1x32x64xbf16>
    %159 = vector.shape_cast %158 : vector<1x32x64xbf16> to vector<32x64xbf16>
    %cst_64 = arith.constant dense<0.000000e+00> : vector<32x64xf32>
    %160 = tpu.matmul %157, %159, %cst_64 {dimension_numbers = #tpu.dot_dimension_numbers<[1], [0], [0], [1], [0, 0, 1, 1], [], []>} : vector<32x32xbf16>, vector<32x64xbf16>, vector<32x64xf32> -> vector<32x64xf32>
    %c0_65 = arith.constant 0 : index
    %c0_66 = arith.constant 0 : index
    %c0_67 = arith.constant 0 : index
    %161 = vector.load %arg14[%c0_65, %c0_66, %c0_67] : memref<1x1x64xf32, #tpu.memory_space<vmem>>, vector<1x1x64xf32>
    %162 = vector.shape_cast %161 : vector<1x1x64xf32> to vector<1x64xf32>
    %163 = vector.broadcast %162 : vector<1x64xf32> to vector<32x64xf32>
    %164 = arith.addf %160, %163 : vector<32x64xf32>
    %cst_68 = arith.constant 5.000000e-01 : f32
    %165 = vector.broadcast %cst_68 : f32 to vector<32x64xf32>
    %166 = arith.mulf %165, %164 : vector<32x64xf32>
    %cst_69 = arith.constant 0.707106769 : f32
    %167 = vector.broadcast %cst_69 : f32 to vector<32x64xf32>
    %168 = arith.mulf %164, %167 : vector<32x64xf32>
    %169 = math.absf %168 : vector<32x64xf32>
    %cst_70 = arith.constant 0.327591091 : f32
    %170 = vector.broadcast %cst_70 : f32 to vector<32x64xf32>
    %171 = arith.mulf %170, %169 : vector<32x64xf32>
    %cst_71 = arith.constant 1.000000e+00 : f32
    %172 = vector.broadcast %cst_71 : f32 to vector<32x64xf32>
    %173 = arith.addf %172, %171 : vector<32x64xf32>
    %cst_72 = arith.constant 1.000000e+00 : f32
    %174 = vector.broadcast %cst_72 : f32 to vector<32x64xf32>
    %175 = arith.divf %174, %173 : vector<32x64xf32>
    %cst_73 = arith.constant 1.06140542 : f32
    %176 = vector.broadcast %cst_73 : f32 to vector<32x64xf32>
    %177 = arith.mulf %176, %175 : vector<32x64xf32>
    %cst_74 = arith.constant -1.45315206 : f32
    %178 = vector.broadcast %cst_74 : f32 to vector<32x64xf32>
    %179 = arith.addf %177, %178 : vector<32x64xf32>
    %180 = arith.mulf %179, %175 : vector<32x64xf32>
    %cst_75 = arith.constant 1.42141378 : f32
    %181 = vector.broadcast %cst_75 : f32 to vector<32x64xf32>
    %182 = arith.addf %180, %181 : vector<32x64xf32>
    %183 = arith.mulf %182, %175 : vector<32x64xf32>
    %cst_76 = arith.constant -0.284496725 : f32
    %184 = vector.broadcast %cst_76 : f32 to vector<32x64xf32>
    %185 = arith.addf %183, %184 : vector<32x64xf32>
    %186 = arith.mulf %185, %175 : vector<32x64xf32>
    %cst_77 = arith.constant 0.254829586 : f32
    %187 = vector.broadcast %cst_77 : f32 to vector<32x64xf32>
    %188 = arith.addf %186, %187 : vector<32x64xf32>
    %189 = arith.mulf %188, %175 : vector<32x64xf32>
    %cst_78 = arith.constant 0.000000e+00 : f32
    %190 = vector.broadcast %cst_78 : f32 to vector<32x64xf32>
    %191 = arith.subf %190, %169 : vector<32x64xf32>
    %192 = arith.mulf %191, %169 : vector<32x64xf32>
    %193 = math.exp %192 : vector<32x64xf32>
    %194 = arith.mulf %189, %193 : vector<32x64xf32>
    %cst_79 = arith.constant 1.000000e+00 : f32
    %195 = vector.broadcast %cst_79 : f32 to vector<32x64xf32>
    %196 = arith.subf %195, %194 : vector<32x64xf32>
    %cst_80 = arith.constant 0.000000e+00 : f32
    %197 = vector.broadcast %cst_80 : f32 to vector<32x64xf32>
    %198 = arith.cmpf olt, %168, %197 : vector<32x64xf32>
    %cst_81 = arith.constant 0.000000e+00 : f32
    %199 = vector.broadcast %cst_81 : f32 to vector<32x64xf32>
    %200 = arith.subf %199, %196 : vector<32x64xf32>
    %201 = arith.select %198, %200, %196 : vector<32x64xi1>, vector<32x64xf32>
    %cst_82 = arith.constant 1.000000e+00 : f32
    %202 = vector.broadcast %cst_82 : f32 to vector<32x64xf32>
    %203 = arith.addf %202, %201 : vector<32x64xf32>
    %204 = arith.mulf %166, %203 : vector<32x64xf32>
    %205 = arith.truncf %204 : vector<32x64xf32> to vector<32x64xbf16>
    %c0_83 = arith.constant 0 : index
    %c0_84 = arith.constant 0 : index
    %c0_85 = arith.constant 0 : index
    %206 = vector.load %arg15[%c0_83, %c0_84, %c0_85] : memref<1x64x32xbf16, #tpu.memory_space<vmem>>, vector<1x64x32xbf16>
    %207 = vector.shape_cast %206 : vector<1x64x32xbf16> to vector<64x32xbf16>
    %cst_86 = arith.constant dense<0.000000e+00> : vector<32x32xf32>
    %208 = tpu.matmul %205, %207, %cst_86 {dimension_numbers = #tpu.dot_dimension_numbers<[1], [0], [0], [1], [0, 0, 1, 1], [], []>} : vector<32x64xbf16>, vector<64x32xbf16>, vector<32x32xf32> -> vector<32x32xf32>
    %c0_87 = arith.constant 0 : index
    %c0_88 = arith.constant 0 : index
    %c0_89 = arith.constant 0 : index
    %209 = vector.load %arg16[%c0_87, %c0_88, %c0_89] : memref<1x1x32xf32, #tpu.memory_space<vmem>>, vector<1x1x32xf32>
    %210 = vector.shape_cast %209 : vector<1x1x32xf32> to vector<1x32xf32>
    %211 = vector.broadcast %210 : vector<1x32xf32> to vector<32x32xf32>
    %212 = arith.addf %208, %211 : vector<32x32xf32>
    %213 = arith.addf %130, %212 : vector<32x32xf32>
    %c1_i32 = arith.constant 1 : i32
    %214 = arith.cmpi slt, %arg1, %c1_i32 : i32
    %215 = arith.extui %214 : i1 to i32
    %c0_i32_90 = arith.constant 0 : i32
    %216 = arith.cmpi ne, %215, %c0_i32_90 : i32
    scf.if %216 {
      %220 = vector.shape_cast %213 : vector<32x32xf32> to vector<2x16x32xf32>
      %c0_93 = arith.constant 0 : index
      %c0_94 = arith.constant 0 : index
      %c0_95 = arith.constant 0 : index
      %221 = vector.load %arg19[%c0_93, %c0_94, %c0_95] : memref<2x16x32xf32, #tpu.memory_space<vmem>>, vector<2x16x32xf32>
      tpu.vector_store %arg19[%c0_93, %c0_94, %c0_95], %220 {strides = array<i32>} : memref<2x16x32xf32, #tpu.memory_space<vmem>>, vector<2x16x32xf32>,
    } else {
    }
    %c1_i32_91 = arith.constant 1 : i32
    %217 = arith.cmpi eq, %arg1, %c1_i32_91 : i32
    %218 = arith.extui %217 : i1 to i32
    %c0_i32_92 = arith.constant 0 : i32
    %219 = arith.cmpi ne, %218, %c0_i32_92 : i32
    scf.if %219 {
      %c0_93 = arith.constant 0 : index
      %c0_94 = arith.constant 0 : index
      %220 = vector.load %arg17[%c0_93, %c0_94] : memref<1x32xf32, #tpu.memory_space<vmem>>, vector<1x32xf32>
      %c0_95 = arith.constant 0 : index
      %c0_96 = arith.constant 0 : index
      %221 = vector.load %arg18[%c0_95, %c0_96] : memref<1x32xf32, #tpu.memory_space<vmem>>, vector<1x32xf32>
      %cst_97 = arith.constant dense<0.000000e+00> : vector<32xf32>
      %222 = vector.multi_reduction <add>, %213, %cst_97 [1] : vector<32x32xf32> to vector<32xf32>
      %223 = vector.shape_cast %222 : vector<32xf32> to vector<32x1xf32>
      %cst_98 = arith.constant 3.200000e+01 : f32
      %224 = vector.broadcast %cst_98 : f32 to vector<32x1xf32>
      %225 = arith.divf %223, %224 : vector<32x1xf32>
      %226 = vector.broadcast %225 : vector<32x1xf32> to vector<32x32xf32>
      %227 = arith.subf %213, %226 : vector<32x32xf32>
      %228 = arith.mulf %227, %227 : vector<32x32xf32>
      %cst_99 = arith.constant dense<0.000000e+00> : vector<32xf32>
      %229 = vector.multi_reduction <add>, %228, %cst_99 [1] : vector<32x32xf32> to vector<32xf32>
      %230 = vector.shape_cast %229 : vector<32xf32> to vector<32x1xf32>
      %cst_100 = arith.constant 3.200000e+01 : f32
      %231 = vector.broadcast %cst_100 : f32 to vector<32x1xf32>
      %232 = arith.divf %230, %231 : vector<32x1xf32>
      %233 = vector.broadcast %225 : vector<32x1xf32> to vector<32x32xf32>
      %234 = arith.subf %213, %233 : vector<32x32xf32>
      %cst_101 = arith.constant 9.99999974E-6 : f32
      %235 = vector.broadcast %cst_101 : f32 to vector<32x1xf32>
      %236 = arith.addf %232, %235 : vector<32x1xf32>
      %237 = math.rsqrt %236 : vector<32x1xf32>
      %238 = vector.broadcast %237 : vector<32x1xf32> to vector<32x32xf32>
      %239 = arith.mulf %234, %238 : vector<32x32xf32>
      %240 = vector.broadcast %220 : vector<1x32xf32> to vector<32x32xf32>
      %241 = arith.mulf %239, %240 : vector<32x32xf32>
      %242 = vector.broadcast %221 : vector<1x32xf32> to vector<32x32xf32>
      %243 = arith.addf %241, %242 : vector<32x32xf32>
      %244 = vector.shape_cast %243 : vector<32x32xf32> to vector<2x16x32xf32>
      %c0_102 = arith.constant 0 : index
      %c0_103 = arith.constant 0 : index
      %c0_104 = arith.constant 0 : index
      %245 = vector.load %arg19[%c0_102, %c0_103, %c0_104] : memref<2x16x32xf32, #tpu.memory_space<vmem>>, vector<2x16x32xf32>
      tpu.vector_store %arg19[%c0_102, %c0_103, %c0_104], %244 {strides = array<i32>} : memref<2x16x32xf32, #tpu.memory_space<vmem>>, vector<2x16x32xf32>,
    } else {
    }
    return
  }
  func.func @transform_0(%arg0: i32, %arg1: i32) -> (i32, i32, i32) {
    %c0_i32 = arith.constant 0 : i32
    %c0_i32_0 = arith.constant 0 : i32
    %c0_i32_1 = arith.constant 0 : i32
    return %arg0, %c0_i32, %c0_i32_0 : i32, i32, i32
  }
  func.func @transform_1(%arg0: i32, %arg1: i32) -> (i32, i32) {
    %c0_i32 = arith.constant 0 : i32
    %c0_i32_0 = arith.constant 0 : i32
    %c0_i32_1 = arith.constant 0 : i32
    return %c0_i32, %c0_i32_0 : i32, i32
  }
  func.func @transform_2(%arg0: i32, %arg1: i32) -> (i32, i32) {
    %c0_i32 = arith.constant 0 : i32
    %c0_i32_0 = arith.constant 0 : i32
    %c0_i32_1 = arith.constant 0 : i32
    return %c0_i32, %c0_i32_0 : i32, i32
  }
  func.func @transform_3(%arg0: i32, %arg1: i32) -> (i32, i32) {
    %c0_i32 = arith.constant 0 : i32
    %c0_i32_0 = arith.constant 0 : i32
    %c0_i32_1 = arith.constant 0 : i32
    return %c0_i32, %c0_i32_0 : i32, i32
  }
  func.func @transform_4(%arg0: i32, %arg1: i32) -> (i32, i32, i32) {
    %c0_i32 = arith.constant 0 : i32
    %c0_i32_0 = arith.constant 0 : i32
    %c0_i32_1 = arith.constant 0 : i32
    return %arg1, %c0_i32, %c0_i32_0 : i32, i32, i32
  }
  func.func @transform_5(%arg0: i32, %arg1: i32) -> (i32, i32, i32) {
    %c0_i32 = arith.constant 0 : i32
    %c0_i32_0 = arith.constant 0 : i32
    %c0_i32_1 = arith.constant 0 : i32
    return %arg1, %c0_i32, %c0_i32_0 : i32, i32, i32
  }
  func.func @transform_6(%arg0: i32, %arg1: i32) -> (i32, i32, i32) {
    %c0_i32 = arith.constant 0 : i32
    %c0_i32_0 = arith.constant 0 : i32
    %c0_i32_1 = arith.constant 0 : i32
    return %arg1, %c0_i32, %c0_i32_0 : i32, i32, i32
  }
  func.func @transform_7(%arg0: i32, %arg1: i32) -> (i32, i32, i32) {
    %c0_i32 = arith.constant 0 : i32
    %c0_i32_0 = arith.constant 0 : i32
    %c0_i32_1 = arith.constant 0 : i32
    return %arg1, %c0_i32, %c0_i32_0 : i32, i32, i32
  }
  func.func @transform_8(%arg0: i32, %arg1: i32) -> (i32, i32, i32) {
    %c0_i32 = arith.constant 0 : i32
    %c0_i32_0 = arith.constant 0 : i32
    %c0_i32_1 = arith.constant 0 : i32
    return %arg1, %c0_i32, %c0_i32_0 : i32, i32, i32
  }
  func.func @transform_9(%arg0: i32, %arg1: i32) -> (i32, i32, i32) {
    %c0_i32 = arith.constant 0 : i32
    %c0_i32_0 = arith.constant 0 : i32
    %c0_i32_1 = arith.constant 0 : i32
    return %arg1, %c0_i32, %c0_i32_0 : i32, i32, i32
  }
  func.func @transform_10(%arg0: i32, %arg1: i32) -> (i32, i32, i32) {
    %c0_i32 = arith.constant 0 : i32
    %c0_i32_0 = arith.constant 0 : i32
    %c0_i32_1 = arith.constant 0 : i32
    return %arg1, %c0_i32, %c0_i32_0 : i32, i32, i32
  }
  func.func @transform_11(%arg0: i32, %arg1: i32) -> (i32, i32, i32) {
    %c0_i32 = arith.constant 0 : i32
    %c0_i32_0 = arith.constant 0 : i32
    %c0_i32_1 = arith.constant 0 : i32
    return %arg1, %c0_i32, %c0_i32_0 : i32, i32, i32
  }
  func.func @transform_12(%arg0: i32, %arg1: i32) -> (i32, i32, i32) {
    %c0_i32 = arith.constant 0 : i32
    %c0_i32_0 = arith.constant 0 : i32
    %c0_i32_1 = arith.constant 0 : i32
    return %arg1, %c0_i32, %c0_i32_0 : i32, i32, i32
  }
  func.func @transform_13(%arg0: i32, %arg1: i32) -> (i32, i32, i32) {
    %c0_i32 = arith.constant 0 : i32
    %c0_i32_0 = arith.constant 0 : i32
    %c0_i32_1 = arith.constant 0 : i32
    return %arg1, %c0_i32, %c0_i32_0 : i32, i32, i32
  }
  func.func @transform_14(%arg0: i32, %arg1: i32) -> (i32, i32, i32) {
    %c0_i32 = arith.constant 0 : i32
    %c0_i32_0 = arith.constant 0 : i32
    %c0_i32_1 = arith.constant 0 : i32
    return %arg1, %c0_i32, %c0_i32_0 : i32, i32, i32
  }
  func.func @transform_15(%arg0: i32, %arg1: i32) -> (i32, i32) {
    %c0_i32 = arith.constant 0 : i32
    %c0_i32_0 = arith.constant 0 : i32
    %c0_i32_1 = arith.constant 0 : i32
    return %c0_i32, %c0_i32_0 : i32, i32
  }
  func.func @transform_16(%arg0: i32, %arg1: i32) -> (i32, i32) {
    %c0_i32 = arith.constant 0 : i32
    %c0_i32_0 = arith.constant 0 : i32
    %c0_i32_1 = arith.constant 0 : i32
    return %c0_i32, %c0_i32_0 : i32, i32
  }
  func.func @transform_17(%arg0: i32, %arg1: i32) -> (i32, i32, i32) {
    %c0_i32 = arith.constant 0 : i32
    %c0_i32_0 = arith.constant 0 : i32
    %c0_i32_1 = arith.constant 0 : i32
    return %arg0, %c0_i32, %c0_i32_0 : i32, i32, i32
  }
}

</mosaic_0001>

<bundles_post_ra>
// kernel: vit_forward.1
= control target key start
LH: loop header
LB: loop body
LE: loop exit
PB: predicated region body
PF: predicated region fallthrough
CT: control target
= control target key end

     0   :  { %s3994_s0 = inlined_call_operand.vmem [shape: bf16[2,16,64], index: 0, kind: input, shape index: {}]   ;;  %s3995_s1 = inlined_call_operand.vmem [shape: bf16[64,32], index: 1, kind: input, shape index: {}]   ;;  %s3996_s2 = inlined_call_operand.vmem [shape: f32[1,32], index: 2, kind: input, shape index: {}]   ;;  %s3997_s3 = inlined_call_operand.vmem [shape: f32[16,32], index: 3, kind: input, shape index: {}]   ;;  %s3998_s4 = inlined_call_operand.vmem [shape: f32[2,1,32], index: 4, kind: input, shape index: {}]   ;;  %s3999_s5 = inlined_call_operand.vmem [shape: f32[2,1,32], index: 5, kind: input, shape index: {}]   ;;  %s4000_s6 = inlined_call_operand.vmem [shape: bf16[2,32,96], index: 6, kind: input, shape index: {}]   ;;  %s4001_s7 = inlined_call_operand.vmem [shape: bf16[2,32,32], index: 7, kind: input, shape index: {}]   ;;  %s4002_s8 = inlined_call_operand.vmem [shape: f32[2,1,32], index: 8, kind: input, shape index: {}]   ;;  %s4003_s9 = inlined_call_operand.vmem [shape: f32[2,1,32], index: 9, kind: input, shape index: {}]   ;;  %s4004_s10 = inlined_call_operand.vmem [shape: f32[2,1,32], index: 10, kind: input, shape index: {}]   ;;  %s4005_s11 = inlined_call_operand.vmem [shape: bf16[2,32,64], index: 11, kind: input, shape index: {}]   ;;  %s4006_s12 = inlined_call_operand.vmem [shape: f32[2,1,64], index: 12, kind: input, shape index: {}]   ;;  %s4007_s13 = inlined_call_operand.vmem [shape: bf16[2,64,32], index: 13, kind: input, shape index: {}]   ;;  %s4008_s14 = inlined_call_operand.vmem [shape: f32[2,1,32], index: 14, kind: input, shape index: {}]   ;;  %s4009_s15 = inlined_call_operand.vmem [shape: f32[1,32], index: 15, kind: input, shape index: {}]   ;;  %s4010_s16 = inlined_call_operand.vmem [shape: f32[1,32], index: 16, kind: input, shape index: {}]   ;;  %s4011_s17 = inlined_call_operand.hbm [shape: f32[2,16,32], index: 17, kind: output, shape index: {}]  }
   0x1   :  { %4017 = sst [smem:[#allocation8_spill]] %s3994_s0 }
   0x2   :  { %4018 = sst [smem:[#allocation9_spill]] %s3995_s1 }
   0x3   :  { %4019 = sst [smem:[#allocation10_spill]] %s4000_s6 }
   0x4   :  { %4020 = sst [smem:[#allocation11_spill]] %s4001_s7 }
   0x5   :  { %4021 = sst [smem:[#allocation12_spill]] %s4002_s8 }
   0x6   :  { %4022 = sst [smem:[#allocation13_spill]] %s4009_s15 }
   0x7   :  { %4023 = sst [smem:[#allocation14_spill]] %s4010_s16 }
   0x8   :  { %4024 = sst [smem:[#allocation15_spill]] %s4011_s17 }
   0x9   :  { %22 = vsyncpa [#allocation3], 0  ;;  %s3530_s24 = smov 0   ;;  %s3532_s25 = smov 0  }
   0xa   :  { %s3534_s26 = smov 0  }
   0xb LB: > { %4025 = sst [smem:[#allocation5_spill]] %s3418_s25  ;;  %s37_s28 = sadd.s32 1, %s3418_s25  ;;  %s3422_s26 = sphi %s3534_s26, %s28_s26   ;;  %s3418_s25 = sphi %s3532_s25, %s4047_s25   ;;  %s3414_s24 = sphi %s3530_s24, %s4046_s24  }
   0xc   : > { %4026 = sst [smem:[#allocation6_spill]] %s3422_s26  ;;  %p38_p0 = scmp.ge.s32.totalorder %s37_s28, 2 }
   0xd   : > { %p2886_p1 = scmp.ge.s32.totalorder %s3422_s26, 1  ;;  %p598_p2 = scmp.lt.s32.totalorder %s3422_s26, 3 }
   0xe   : > { %s4049_s28 = smov (%p38_p0, %s37_s28), 0 }
   0xf   : > { %4027 = sst [smem:[#allocation7_spill]] %s4049_s28  ;;  %p599_p3 = pnand %p2886_p1, %p598_p2 }
  0x10   : > { %p694_p4 = scmp.lt.s32.totalorder (!%p599_p3), %s3414_s24, 1  ;;  %s4029_s6 = sld [smem:[#allocation10_spill]] (!%p599_p3) }
  0x11   : > { %602 = sbr.rel (%p599_p3) target bundleno = 4908 (0x132c), region = 88  ;;  %s4030_s7 = sld [smem:[#allocation11_spill]] (!%p599_p3) }
  0x12   : > { %p2895_p5 = scmp.ne.s32.totalorder (!%p599_p3), %s3414_s24, 0 }
  0x18   : > { %s3553_s29 = scalar_select %p694_p4, %s3414_s24, 1 }
  0x19   : > { %740 = sbr.rel (%p2895_p5) target bundleno = 268 (0x10c), region = 92  ;;  %s4031_s1 = sld [smem:[#allocation9_spill]] (!%p2895_p5)  ;;  %vm794_vm0 = vcmask (!%p2895_p5), 523264   ;;  %v2896_v6 = vld [vmem:[%s3996_s2] ss:$0 sm:$0xff] (!%p2895_p5)  ;;  %vm856_vm1 = vcmask (!%p2895_p5), 261120  }
  0x1a   : > { %s2958_s21 = sshll.u32 %s3553_s29, 4  ;;  %s718_s15 = scalar_lea.vmem %s4004_s10, %s3553_s29  ;;  %v850_v8 = vld [vmem:[%s3997_s3] sm:$0xff] (!%p2895_p5)  ;;  %v851_v13 = vld [vmem:[%s3997_s3 + $0x8] sm:$0xff] (!%p2895_p5) }
  0x1b   : > { %s3571_s30 = scalar_lea.vmem %s4029_s6, %s2958_s21  ;;  %s3576_s26 = scalar_lea.vmem %s4030_s7, %s2958_s21 }
  0x1c   : > { %s3589_s27 = scalar_lea.vmem %s4005_s11, %s2958_s21  ;;  %s726_s6 = scalar_lea.vmem %s4006_s12, %s3553_s29 }
  0x1d   : > { %s2961_s17 = sshll.u32 %s3553_s29, 5  ;;  %s734_s8 = scalar_lea.vmem %s4008_s14, %s3553_s29 }
  0x1e   : > { %s3603_s19 = scalar_lea.vmem %s4007_s13, %s2961_s17  ;;  %s4032_s25 = sld [smem:[#allocation8_spill]] (!%p2895_p5) }
  0x1f   : > { %v3248_v0 = vld [vmem:[%s4031_s1] sm:$0xff] (!%p2895_p5)   ;;  %v3249_v1 = vld [vmem:[%s4031_s1 + $0x8] sm:$0xff] (!%p2895_p5)   ;;  %v3250_v2 = vld [vmem:[%s4031_s1 + $0x10] sm:$0xff] (!%p2895_p5)  }
  0x20   : > { %3026 = vmatprep.subr.bf16.mxu0 %v3248_v0  ;;  %v3251_v4 = vld [vmem:[%s4031_s1 + $0x18] sm:$0xff]  }
  0x21   : > { %3027 = vmatpush3.bf16.msra.mxu0 %v3248_v0 }
  0x22   : > { %3028 = vmatprep.subr.bf16.mxu0 %v3249_v1 }
  0x24   : > { %s4033_s16 = smov %s4032_s25  ;;  %v3252_v3 = vld [vmem:[%s4032_s25] sm:$0xff]  }
  0x25   : > { %3034 = vmatprep.mubr.msk.bf16.mxu0 %vm794_vm0, %v3252_v3  ;;  %3029 = vmatpush3.bf16.msra.mxu0 %v3249_v1  ;;  %v3253_v5 = vld [vmem:[%s4033_s16 + $0x8] sm:$0xff]  }
  0x26   : > { %3030 = vmatprep.subr.bf16.mxu0 %v3250_v2 }
  0x29   : > { %3031 = vmatpush3.bf16.msra.mxu0 %v3250_v2 }
  0x2a   : > { %3032 = vmatprep.subr.bf16.mxu0 %v3251_v4 }
  0x2d   : > { %3033 = vmatpush3.bf16.msra.mxu0 %v3251_v4 }
  0x30   : > { %3035 = vmatmul.mubr.msk.bf16.vlgmr.msra.gmra.mrb[0].mxu0 %vm794_vm0, %v3253_v5 }
 0x103   : > { %v3036_v7 = vpop.f32.mrb[0].mxu0 }
 0x104   : > { %v844_v9 = vadd.f32 %v3036_v7, %v2896_v6  ;;  %v835_v10 = vpop.f32.mrb[1].mxu0 }
 0x105   : > { %v836_v11 = vadd.f32 %v2896_v6, %v835_v10  ;;  %v3037_v12 = vpop.f32.mrb[2].mxu0 }
 0x106   : > { %v854_v14 = vadd.f32 %v850_v8, %v844_v9  ;;  %v847_v15 = vadd.f32 %v3037_v12, %v2896_v6  ;;  %v838_v16 = vpop.f32.mrb[3].mxu0 }
 0x107   : > { %v852_v17 = vadd.f32 %v850_v8, %v836_v11  ;;  %v839_v18 = vadd.f32 %v2896_v6, %v838_v16 }
 0x108   : > { %859 = vst.msk [vmem:[#allocation2 + $0x10] sm:$0xff] %vm856_vm1, %v854_v14  ;;  %v855_v19 = vadd.f32 %v851_v13, %v847_v15 }
 0x109   : > { %857 = vst.msk [vmem:[#allocation2] sm:$0xff] %vm856_vm1, %v852_v17  ;;  %v853_v20 = vadd.f32 %v851_v13, %v839_v18 }
 0x10a   : > { %860 = vst.msk [vmem:[#allocation2 + $0x18] sm:$0xff] %vm856_vm1, %v855_v19 }
 0x10b   : > { %858 = vst.msk [vmem:[#allocation2 + $0x8] sm:$0xff] %vm856_vm1, %v853_v20 }
 0x10c PF: > { %vm867_vm2 = vcmask 261120   ;;  %v3254_v49 = vld [vmem:[%s3571_s30] sm:$0xff]   ;;  %v3255_v50 = vld [vmem:[%s3571_s30 + $0x8] sm:$0xff]   ;;  %s4034_s20 = scalar_lea.vmem %s3998_s4, %s3553_s29  ;;  %s4035_s23 = scalar_lea.vmem %s3999_s5, %s3553_s29  ;;  %v3424_v19 = vmov 0.0   ;;  %vm3425_vm3 = vmmov 0   ;;  %vm1019_vm4 = vcmask 64512  }
 0x10d   : > { %3038 = vmatprep.subr.bf16.mxu1 %v3254_v49  ;;  %v2905_v1 = vld [vmem:[%s4034_s20] ss:$0 sm:$0xff]  ;;  %3052 = vmatprep.subr.bf16.mxu0 %v3424_v19  ;;  %s3426_s7 = smov 96   ;;  %vm1117_vm5 = vcmask 130048   ;;  %s3427_s28 = smov 88   ;;  %vm1512_vm6 = vcmask 1043456  }
 0x10e   : > { %3039 = vmatpush3.bf16.msra.mxu1 %v3254_v49  ;;  %v2906_v7 = vld [vmem:[%s4035_s23] ss:$0 sm:$0xff]  ;;  %3054 = vmatprep.mubr.msk.bf16.mxu0 %vm3425_vm3, %v3424_v19  ;;  %s3428_s0 = smov 64   ;;  %s3429_s17 = smov 120   ;;  %vm2555_vm11 = vcmask 523264  }
 0x10f   : > { %v863_v22 = vld [vmem:[#allocation2 + $0x10] sm:$0xff]  ;;  %3040 = vmatprep.subr.bf16.mxu1 %v3255_v50  ;;  %s3430_s25 = smov 80   ;;  %s3431_s30 = smov 112  }
 0x110   : > { %v861_v21 = vld [vmem:[#allocation2] sm:$0xff]  ;;  %v874_v25 = vsel %vm867_vm2, %v863_v22, 0.0  ;;  %s3432_s18 = smov 56   ;;  %s3433_s20 = smov 48  }
 0x111   : > { %v868_v24 = vsel %vm867_vm2, %v861_v21, 0.0  ;;  %v864_v26 = vld [vmem:[#allocation2 + $0x18] sm:$0xff]  ;;  %875 = vadd.xlane.f32.xlu1 %v874_v25  ;;  %s3434_s21 = smov 72   ;;  %s3435_s22 = smov 104  }
 0x112   : > { %v862_v23 = vld [vmem:[#allocation2 + $0x8] sm:$0xff]  ;;  %869 = vadd.xlane.f32.xlu0 %v868_v24  ;;  %v877_v28 = vsel %vm867_vm2, %v864_v26, 0.0  ;;  %3041 = vmatpush3.bf16.msra.mxu1 %v3255_v50  ;;  %s3436_s23 = smov 40   ;;  %p2950_p6 = scmp.ge.s32.totalorder %s3414_s24, 1 }
 0x113   : > { %v871_v27 = vsel %vm867_vm2, %v862_v23, 0.0  ;;  %3046 = vmatprep.subr.bf16.mxu1 %v3424_v19 }
 0x115   : > { %878 = vadd.xlane.f32.xlu1 %v877_v28 }
 0x116   : > { %872 = vadd.xlane.f32.xlu0 %v871_v27 }
 0x19e   : > { %v876_v30 = vpop.xlane.xlu1 %875 }
 0x19f   : > { %v870_v29 = vpop.xlane.xlu0 %869  ;;  %v883_v32 = vmul.f32 0.03125, %v876_v30 }
 0x1a0   : > { %v881_v31 = vmul.f32 0.03125, %v870_v29 }
 0x1a1   : > { %v887_v34 = vsub.f32 %v863_v22, %v883_v32 }
 0x1a2   : > { %v885_v33 = vsub.f32 %v861_v21, %v881_v31  ;;  %v879_v36 = vpop.xlane.xlu1 %878 }
 0x1a3   : > { %v873_v35 = vpop.xlane.xlu0 %872  ;;  %v884_v38 = vmul.f32 0.03125, %v879_v36  ;;  %v891_v40 = vmul.f32 %v887_v34, %v887_v34 }
 0x1a4   : > { %v882_v37 = vmul.f32 0.03125, %v873_v35  ;;  %v889_v39 = vmul.f32 %v885_v33, %v885_v33 }
 0x1a5   : > { %v888_v42 = vsub.f32 %v864_v26, %v884_v38  ;;  %v899_v44 = vsel %vm867_vm2, %v891_v40, 0.0 }
 0x1a6   : > { %v886_v41 = vsub.f32 %v862_v23, %v882_v37  ;;  %v893_v43 = vsel %vm867_vm2, %v889_v39, 0.0 }
 0x1a7   : > { %894 = vadd.xlane.f32.xlu0 %v893_v43  ;;  %v892_v46 = vmul.f32 %v888_v42, %v888_v42 }
 0x1a8   : > { %v890_v45 = vmul.f32 %v886_v41, %v886_v41 }
 0x1a9   : > { %v902_v48 = vsel %vm867_vm2, %v892_v46, 0.0 }
 0x1aa   : > { %v896_v47 = vsel %vm867_vm2, %v890_v45, 0.0 }
 0x1ab   : > { %900 = vadd.xlane.f32.xlu0 %v899_v44  ;;  %897 = vadd.xlane.f32.xlu1 %v896_v47 }
 0x1af   : > { %903 = vadd.xlane.f32.xlu1 %v902_v48 }
 0x234   : > { %v895_v51 = vpop.xlane.xlu0 %894 }
 0x235   : > { %v905_v52 = vmul.f32 0.03125, %v895_v51 }
 0x237   : > { %v909_v53 = vadd.f32 1e-05, %v905_v52 }
 0x238   : > { %v898_v54 = vpop.xlane.xlu1 %897  ;;  %v901_v55 = vpop.xlane.xlu0 %900 }
 0x239   : > { %3262 = vrsqrt.f32 %v909_v53  ;;  %v906_v56 = vmul.f32 0.03125, %v898_v54  ;;  %v907_v57 = vmul.f32 0.03125, %v901_v55 }
 0x23b   : > { %v910_v58 = vadd.f32 1e-05, %v906_v56  ;;  %v911_v59 = vadd.f32 1e-05, %v907_v57 }
 0x23c   : > { %v904_v60 = vpop.xlane.xlu1 %903 }
 0x23d   : > { %3264 = vrsqrt.f32 %v910_v58  ;;  %v908_v61 = vmul.f32 0.03125, %v904_v60 }
 0x23e   : > { %3266 = vrsqrt.f32 %v911_v59 }
 0x23f   : > { %v912_v62 = vadd.f32 1e-05, %v908_v61 }
 0x241   : > { %3268 = vrsqrt.f32 %v912_v62 }
 0x243   : > { %v3263_v63 = vpop.eup %3262 }
 0x244   : > { %v917_v0 = vmul.f32 %v3263_v63, %v885_v33 }
 0x246   : > { %v927_v5 = vmul.f32 %v2905_v1, %v917_v0 }
 0x247   : > { %v3265_v2 = vpop.eup %3264 }
 0x248   : > { %v3267_v3 = vpop.eup %3266  ;;  %v918_v4 = vmul.f32 %v3265_v2, %v886_v41  ;;  %v937_v11 = vadd.f32 %v2906_v7, %v927_v5 }
 0x249   : > { %v919_v6 = vmul.f32 %v3267_v3, %v887_v34 }
 0x24a   : > { %v928_v8 = vmul.f32 %v2905_v1, %v918_v4 }
 0x24b   : > { %v3269_v9 = vpop.eup %3268  ;;  %v929_v13 = vmul.f32 %v2905_v1, %v919_v6 }
 0x24c   : > { %v920_v10 = vmul.f32 %v3269_v9, %v888_v42  ;;  %v938_v12 = vadd.f32 %v2906_v7, %v928_v8 }
 0x24d   : > { %v939_v16 = vadd.f32 %v2906_v7, %v929_v13 }
 0x24e   : > { %v941_v14 = vpack.c.bf16 %v938_v12, %v937_v11  ;;  %v930_v15 = vmul.f32 %v2905_v1, %v920_v10 }
 0x250   : > { %3042 = vmatprep.mubr.msk.bf16.mxu1 %vm867_vm2, %v941_v14  ;;  %v940_v17 = vadd.f32 %v2906_v7, %v930_v15 }
 0x252   : > { %v942_v18 = vpack.c.bf16 %v940_v17, %v939_v16 }
 0x254   : > { %3043 = vmatmul.mubr.msk.bf16.vlgmr.msra.gmra.mrb[0].mxu1 %vm867_vm2, %v942_v18 }
 0x255   : > { %3048 = vmatprep.mubr.msk.bf16.mxu1 %vm3425_vm3, %v3424_v19 }
 0x327   : > { %v3044_v20 = vpop.f32.mrb[0].mxu1 }
 0x328   : > { %v999_v21 = vpop.f32.mrb[1].mxu1 }
 0x329   : > { %v3045_v22 = vpop.f32.mrb[2].mxu1 }
 0x32a   : > { %v3661_v23 = vpack.c.bf16 %v3045_v22, %v3044_v20  ;;  %v1002_v24 = vpop.f32.mrb[3].mxu1 }
 0x32b   : > { %v3663_v25 = vpack.c.bf16 %v1002_v24, %v999_v21 }
 0x32c   : > { %1068 = vrot.lane.b32.xlu0 %v3661_v23, %s3426_s7 }
 0x32d   : > { %1017 = vrot.lane.b32.xlu1 %v3663_v25, %s3426_s7 }
 0x39e   : > { %v1069_v26 = vpop.permute.xlu0 %1068 }
 0x39f   : > { %v1018_v27 = vpop.permute.xlu1 %1017  ;;  %v1074_v28 = vsel %vm1019_vm4, %v1069_v26, 0 }
 0x3a0   : > { %v1024_v29 = vsel %vm1019_vm4, %v1018_v27, 0  ;;  %3053 = vmatpush3.bf16.xpose.msra.mxu0 %v1074_v28 }
 0x3a1   : > { %3047 = vmatpush3.bf16.xpose.msra.mxu1 %v1024_v29  ;;  %3064 = vmatprep.subr.bf16.mxu0 %v3424_v19 }
 0x3a2   : > { %3058 = vmatprep.subr.bf16.mxu1 %v3424_v19 }
 0x3a7   : > { %3055 = vmatmul.mubr.msk.bf16.vlgmr.msra.gmra.mrb[0].mxu0 %vm1019_vm4, %v3661_v23 }
 0x3a8   : > { %3049 = vmatmul.mubr.msk.bf16.vlgmr.msra.gmra.mrb[4].mxu1 %vm1019_vm4, %v3663_v25  ;;  %3066 = vmatprep.mubr.msk.bf16.mxu0 %vm3425_vm3, %v3424_v19 }
 0x3a9   : > { %3060 = vmatprep.mubr.msk.bf16.mxu1 %vm3425_vm3, %v3424_v19 }
 0x47a   : > { %v1110_v30 = vpop.f32.mrb[0].mxu0 }
 0x47b   : > { %v3679_v31 = vpop.f32.mrb[4].mxu1  ;;  %v3056_v32 = vpop.f32.mrb[1].mxu0  ;;  %v1124_v33 = vsel %vm1117_vm5, %v1110_v30, -inf }
 0x47c   : > { %v1113_v34 = vpop.f32.mrb[2].mxu0  ;;  %1125 = vmax.xlane.f32.xlu1 %v1124_v33  ;;  %v3050_v35 = vpop.f32.mrb[5].mxu1  ;;  %v1118_v51 = vsel %vm1117_vm5, %v3679_v31, -inf }
 0x47d   : > { %v1063_v36 = vpop.f32.mrb[6].mxu1  ;;  %v3057_v37 = vpop.f32.mrb[3].mxu0  ;;  %v1127_v38 = vsel %vm1117_vm5, %v1113_v34, -inf }
 0x47e   : > { %1128 = vmax.xlane.f32.xlu0 %v1127_v38  ;;  %v3051_v39 = vpop.f32.mrb[7].mxu1  ;;  %v1121_v50 = vsel %vm1117_vm5, %v1063_v36, -inf }
 0x509   : > { %v1126_v40 = vpop.xlane.xlu1 %1125 }
 0x50a   : > { %v1132_v41 = vsub.f32 %v1110_v30, %v1126_v40 }
 0x50b   : > { %v1129_v42 = vpop.xlane.xlu0 %1128 }
 0x50c   : > { %v1138_v43 = vmul.f32 1.442695, %v1132_v41  ;;  %v1133_v44 = vsub.f32 %v1113_v34, %v1129_v42 }
 0x50e   : > { %3270 = vpow2.f32 %v1138_v43  ;;  %v1140_v45 = vmul.f32 1.442695, %v1133_v44 }
 0x510   : > { %3272 = vpow2.f32 %v1140_v45 }
 0x518   : > { %v3271_v46 = vpop.eup %3270 }
 0x519   : > { %v1148_v47 = vsel %vm1117_vm5, %v3271_v46, 0.0 }
 0x51a   : > { %v3273_v48 = vpop.eup %3272  ;;  %1149 = vadd.xlane.f32.xlu0 %v1148_v47 }
 0x51b   : > { %v1151_v49 = vsel %vm1117_vm5, %v3273_v48, 0.0 }
 0x51c   : > { %1152 = vadd.xlane.f32.xlu1 %v1151_v49 }
 0x52d   : > { %1314 = vrot.lane.b32.xlu1 %v3661_v23, %s3427_s28 }
 0x530   : > { %1211 = vrot.lane.b32.xlu0 %v3661_v23, %s3428_s0 }
 0x531   : > { %1312 = vrot.lane.b32.xlu1 %v3661_v23, %s3429_s17 }
 0x54f   : > { %1122 = vmax.xlane.f32.xlu0 %v1121_v50 }
 0x555   : > { %1119 = vmax.xlane.f32.xlu1 %v1118_v51 }
 0x566   : > { %1164 = vrot.lane.b32.xlu1 %v3663_v25, %s3428_s0 }
 0x56a   : > { %1261 = vrot.lane.b32.xlu1 %v3663_v25, %s3429_s17 }
 0x5a7   : > { %v1150_v52 = vpop.xlane.xlu0 %1149 }
 0x5a8   : > { %3274 = vrcp.f32 %v1150_v52 }
 0x5a9   : > { %v1153_v53 = vpop.xlane.xlu1 %1152 }
 0x5aa   : > { %3276 = vrcp.f32 %v1153_v53 }
 0x5ab   : > { %v1212_v54 = vpop.permute.xlu0 %1211 }
 0x5ac   : > { %3065 = vmatpush3.bf16.msra.mxu0 %v1212_v54 }
 0x5ad   : > { %3076 = vmatprep.subr.bf16.mxu0 %v3424_v19  ;;  %v1315_v59 = vpop.permute.xlu1 %1314 }
 0x5ae   : > { %v1320_v61 = vsel %vm1019_vm4, %v1315_v59, 0 }
 0x5b1   : > { %v1313_v62 = vpop.permute.xlu1 %1312 }
 0x5b2   : > { %v3275_v55 = vpop.eup %3274 }
 0x5b3   : > { %v1160_v57 = vmul.f32 %v3275_v55, %v3271_v46 }
 0x5b4   : > { %v3277_v56 = vpop.eup %3276 }
 0x5b5   : > { %v1161_v58 = vmul.f32 %v3277_v56, %v3273_v48 }
 0x5b7   : > { %v1163_v60 = vpack.c.bf16 %v1161_v58, %v1160_v57 }
 0x5b9   : > { %3067 = vmatmul.mubr.msk.bf16.vlgmr.msra.gmra.mrb[4].mxu0 %vm1117_vm5, %v1163_v60 }
 0x5ba   : > { %3077 = vmatpush3.bf16.xpose.msra.mxu0 %v1320_v61  ;;  %3078 = vmatprep.mubr.msk.bf16.mxu0 %vm3425_vm3, %v3424_v19 }
 0x5bb   : > { %3088 = vmatprep.subr.bf16.mxu0 %v3424_v19 }
 0x5c1   : > { %3079 = vmatmul.mubr.msk.bf16.vlgmr.msra.gmra.mrb[8].mxu0 %vm1019_vm4, %v1313_v62 }
 0x5c2   : > { %3090 = vmatprep.mubr.msk.bf16.mxu0 %vm3425_vm3, %v3424_v19 }
 0x5dc   : > { %v1123_v63 = vpop.xlane.xlu0 %1122 }
 0x5dd   : > { %v1131_v0 = vsub.f32 %v1063_v36, %v1123_v63 }
 0x5df   : > { %v1136_v3 = vmul.f32 1.442695, %v1131_v0 }
 0x5e2   : > { %v1120_v1 = vpop.xlane.xlu1 %1119 }
 0x5e3   : > { %v1130_v2 = vsub.f32 %v3679_v31, %v1120_v1 }
 0x5e5   : > { %v1134_v4 = vmul.f32 1.442695, %v1130_v2 }
 0x5e6   : > { %v1165_v5 = vpop.permute.xlu1 %1164 }
 0x5e7   : > { %3278 = vpow2.f32 %v1134_v4  ;;  %3059 = vmatpush3.bf16.msra.mxu1 %v1165_v5 }
 0x5e8   : > { %3070 = vmatprep.subr.bf16.mxu1 %v3424_v19  ;;  %3280 = vpow2.f32 %v1136_v3 }
 0x5ea   : > { %v1262_v33 = vpop.permute.xlu1 %1261 }
 0x5f1   : > { %v3279_v6 = vpop.eup %3278 }
 0x5f2   : > { %v1142_v7 = vsel %vm1117_vm5, %v3279_v6, 0.0  ;;  %v3281_v8 = vpop.eup %3280 }
 0x5f3   : > { %1143 = vadd.xlane.f32.xlu0 %v1142_v7  ;;  %v1145_v9 = vsel %vm1117_vm5, %v3281_v8, 0.0 }
 0x5f7   : > { %1146 = vadd.xlane.f32.xlu0 %v1145_v9 }
 0x60d   : > { %1263 = vrot.lane.b32.xlu0 %v3663_v25, %s3427_s28  ;;  %s4036_s28 = sld [smem:[#allocation12_spill]] }
 0x613   : > { %s4037_s0 = scalar_lea.vmem %s4036_s28, %s3553_s29 }
 0x680   : > { %v1144_v10 = vpop.xlane.xlu0 %1143 }
 0x681   : > { %3282 = vrcp.f32 %v1144_v10 }
 0x684   : > { %v1147_v11 = vpop.xlane.xlu0 %1146 }
 0x685   : > { %3284 = vrcp.f32 %v1147_v11 }
 0x688   : > { %v1264_v22 = vpop.permute.xlu0 %1263 }
 0x689   : > { %v1269_v26 = vsel %vm1019_vm4, %v1264_v22, 0 }
 0x68b   : > { %v3283_v13 = vpop.eup %3282 }
 0x68c   : > { %v3709_v12 = vpop.f32.mrb[4].mxu0  ;;  %v1158_v20 = vmul.f32 %v3283_v13, %v3279_v6 }
 0x68d   : > { %v3068_v14 = vpop.f32.mrb[5].mxu0 }
 0x68e   : > { %v3711_v15 = vpop.f32.mrb[6].mxu0 }
 0x68f   : > { %v3285_v16 = vpop.eup %3284  ;;  %v1259_v17 = vpack.c.bf16 %v3711_v15, %v3709_v12  ;;  %v3069_v18 = vpop.f32.mrb[7].mxu0 }
 0x690   : > { %v1159_v21 = vmul.f32 %v3285_v16, %v3281_v8 }
 0x692   : > { %v1162_v24 = vpack.c.bf16 %v1159_v21, %v1158_v20 }
 0x694   : > { %3061 = vmatmul.mubr.msk.bf16.vlgmr.msra.gmra.mrb[8].mxu1 %vm1117_vm5, %v1162_v24  ;;  %v1356_v27 = vpop.f32.mrb[8].mxu0 }
 0x695   : > { %3071 = vmatpush3.bf16.xpose.msra.mxu1 %v1269_v26  ;;  %v3080_v28 = vpop.f32.mrb[9].mxu0  ;;  %v1369_v29 = vsel %vm1117_vm5, %v1356_v27, -inf  ;;  %3072 = vmatprep.mubr.msk.bf16.mxu1 %vm3425_vm3, %v3424_v19 }
 0x696   : > { %1370 = vmax.xlane.f32.xlu1 %v1369_v29  ;;  %v1359_v30 = vpop.f32.mrb[10].mxu0  ;;  %3082 = vmatprep.subr.bf16.mxu1 %v3424_v19 }
 0x697   : > { %v3081_v31 = vpop.f32.mrb[11].mxu0  ;;  %v1372_v32 = vsel %vm1117_vm5, %v1359_v30, -inf }
 0x698   : > { %1373 = vmax.xlane.f32.xlu0 %v1372_v32 }
 0x69c   : > { %3073 = vmatmul.mubr.msk.bf16.vlgmr.msra.gmra.mrb[12].mxu1 %vm1019_vm4, %v1262_v33 }
 0x69d   : > { %3084 = vmatprep.mubr.msk.bf16.mxu1 %vm3425_vm3, %v3424_v19 }
 0x6a7   : > { %1625 = vrot.lane.b32.xlu1 %v3663_v25, %s3430_s25 }
 0x723   : > { %v1371_v34 = vpop.xlane.xlu1 %1370 }
 0x724   : > { %v1377_v35 = vsub.f32 %v1356_v27, %v1371_v34 }
 0x725   : > { %v1374_v36 = vpop.xlane.xlu0 %1373 }
 0x726   : > { %v1383_v37 = vmul.f32 1.442695, %v1377_v35  ;;  %v1378_v38 = vsub.f32 %v1359_v30, %v1374_v36 }
 0x727   : > { %v1626_v55 = vpop.permute.xlu1 %1625 }
 0x728   : > { %3286 = vpow2.f32 %v1383_v37  ;;  %v1385_v39 = vmul.f32 1.442695, %v1378_v38  ;;  %v1631_v1 = vsel %vm1019_vm4, %v1626_v55, 0 }
 0x72a   : > { %3288 = vpow2.f32 %v1385_v39 }
 0x732   : > { %v3287_v40 = vpop.eup %3286 }
 0x733   : > { %v1393_v41 = vsel %vm1117_vm5, %v3287_v40, 0.0 }
 0x734   : > { %v3289_v42 = vpop.eup %3288  ;;  %1394 = vadd.xlane.f32.xlu0 %v1393_v41 }
 0x735   : > { %v1396_v43 = vsel %vm1117_vm5, %v3289_v42, 0.0 }
 0x736   : > { %1397 = vadd.xlane.f32.xlu1 %v1396_v43 }
 0x747   : > { %1623 = vrot.lane.b32.xlu1 %v3663_v25, %s3431_s30 }
 0x74a   : > { %1456 = vrot.lane.b32.xlu0 %v3661_v23, %s3432_s18 }
 0x74b   : > { %1676 = vrot.lane.b32.xlu1 %v3661_v23, %s3430_s25  ;;  %s4038_s25 = scalar_lea.vmem %s4003_s9, %s3553_s29 }
 0x74e   : > { %1674 = vrot.lane.b32.xlu0 %v3661_v23, %s3431_s30 }
 0x767   : > { %v3732_v44 = vpop.f32.mrb[8].mxu1 }
 0x768   : > { %v3062_v45 = vpop.f32.mrb[9].mxu1 }
 0x769   : > { %v3734_v46 = vpop.f32.mrb[10].mxu1 }
 0x76a   : > { %v1258_v47 = vpack.c.bf16 %v3734_v46, %v3732_v44  ;;  %v3063_v48 = vpop.f32.mrb[11].mxu1 }
 0x76f   : > { %v1305_v49 = vpop.f32.mrb[12].mxu1 }
 0x770   : > { %v3074_v50 = vpop.f32.mrb[13].mxu1  ;;  %v1363_v51 = vsel %vm1117_vm5, %v1305_v49, -inf }
 0x771   : > { %1364 = vmax.xlane.f32.xlu1 %v1363_v51  ;;  %v1308_v52 = vpop.f32.mrb[14].mxu1  ;;  %v1260_v51 = vld [vmem:[%s3576_s26] sm:$0xf] }
 0x772   : > { %v3075_v53 = vpop.f32.mrb[15].mxu1  ;;  %v1366_v54 = vsel %vm1117_vm5, %v1308_v52, -inf }
 0x773   : > { %1367 = vmax.xlane.f32.xlu0 %v1366_v54 }
 0x782   : > { %1409 = vrot.lane.b32.xlu1 %v3663_v25, %s3432_s18 }
 0x7c1   : > { %v1395_v56 = vpop.xlane.xlu0 %1394 }
 0x7c2   : > { %3290 = vrcp.f32 %v1395_v56 }
 0x7c3   : > { %v1398_v57 = vpop.xlane.xlu1 %1397 }
 0x7c4   : > { %3292 = vrcp.f32 %v1398_v57 }
 0x7c5   : > { %v1457_v58 = vpop.permute.xlu0 %1456 }
 0x7c6   : > { %3089 = vmatpush3.bf16.msra.mxu0 %v1457_v58 }
 0x7c7   : > { %3106 = vmatprep.subr.bf16.mxu0 %v3424_v19  ;;  %v1624_v0 = vpop.permute.xlu1 %1623 }
 0x7c9   : > { %v1675_v4 = vpop.permute.xlu0 %1674 }
 0x7cb   : > { %v1677_v2 = vpop.permute.xlu1 %1676 }
 0x7cc   : > { %v3291_v59 = vpop.eup %3290  ;;  %v1682_v3 = vsel %vm1019_vm4, %v1677_v2, 0 }
 0x7cd   : > { %v1405_v61 = vmul.f32 %v3291_v59, %v3287_v40 }
 0x7ce   : > { %v3293_v60 = vpop.eup %3292 }
 0x7cf   : > { %v1406_v62 = vmul.f32 %v3293_v60, %v3289_v42 }
 0x7d1   : > { %v1408_v63 = vpack.c.bf16 %v1406_v62, %v1405_v61 }
 0x7d3   : > { %3091 = vmatmul.mubr.msk.bf16.vlgmr.msra.gmra.mrb[12].mxu0 %vm1117_vm5, %v1408_v63 }
 0x7d4   : > { %3107 = vmatpush3.bf16.xpose.msra.mxu0 %v1631_v1  ;;  %3108 = vmatprep.mubr.msk.bf16.mxu0 %vm3425_vm3, %v3424_v19 }
 0x7d5   : > { %3112 = vmatprep.subr.bf16.mxu0 %v3424_v19 }
 0x7db   : > { %3109 = vmatmul.mubr.msk.bf16.vlgmr.msra.gmra.mrb[16].mxu0 %vm1019_vm4, %v1624_v0 }
 0x7dc   : > { %3113 = vmatpush3.bf16.xpose.msra.mxu0 %v1682_v3  ;;  %3114 = vmatprep.mubr.msk.bf16.mxu0 %vm3425_vm3, %v3424_v19 }
 0x7dd   : > { %3124 = vmatprep.subr.bf16.mxu0 %v3424_v19 }
 0x7e3   : > { %3115 = vmatmul.mubr.msk.bf16.vlgmr.msra.gmra.mrb[20].mxu0 %vm1019_vm4, %v1675_v4 }
 0x7e4   : > { %3126 = vmatprep.mubr.msk.bf16.mxu0 %vm3425_vm3, %v3424_v19 }
 0x7fe   : > { %v1365_v5 = vpop.xlane.xlu1 %1364 }
 0x7ff   : > { %v1375_v6 = vsub.f32 %v1305_v49, %v1365_v5  ;;  %v1505_v49 = vld [vmem:[%s3576_s26 + $0x4] sm:$0xf] }
 0x800   : > { %v1368_v7 = vpop.xlane.xlu0 %1367  ;;  %v1514_v50 = vsel %vm1512_vm6, %v1505_v49, 0 }
 0x801   : > { %v1379_v8 = vmul.f32 1.442695, %v1375_v6  ;;  %v1376_v9 = vsub.f32 %v1308_v52, %v1368_v7 }
 0x802   : > { %v1410_v10 = vpop.permute.xlu1 %1409 }
 0x803   : > { %3294 = vpow2.f32 %v1379_v8  ;;  %v1381_v11 = vmul.f32 1.442695, %v1376_v9  ;;  %3083 = vmatpush3.bf16.msra.mxu1 %v1410_v10 }
 0x804   : > { %3198 = vmatprep.subr.msk.bf16.mxu1 %vm1512_vm6, %v1505_v49 }
 0x805   : > { %3296 = vpow2.f32 %v1381_v11 }
 0x80d   : > { %v3295_v13 = vpop.eup %3294 }
 0x80e   : > { %v1387_v14 = vsel %vm1117_vm5, %v3295_v13, 0.0 }
 0x80f   : > { %v3297_v16 = vpop.eup %3296  ;;  %1388 = vadd.xlane.f32.xlu0 %v1387_v14  ;;  %v1572_v14 = vsel %vm1512_vm6, %v1260_v51, 0 }
 0x810   : > { %v1390_v18 = vsel %vm1117_vm5, %v3297_v16, 0.0 }
 0x813   : > { %1391 = vadd.xlane.f32.xlu0 %v1390_v18 }
 0x89c   : > { %v1389_v20 = vpop.xlane.xlu0 %1388 }
 0x89d   : > { %3298 = vrcp.f32 %v1389_v20 }
 0x8a0   : > { %v1392_v21 = vpop.xlane.xlu0 %1391 }
 0x8a1   : > { %3300 = vrcp.f32 %v1392_v21 }
 0x8a6   : > { %v3757_v22 = vpop.f32.mrb[12].mxu0 }
 0x8a7   : > { %v3092_v24 = vpop.f32.mrb[13].mxu0  ;;  %v3299_v27 = vpop.eup %3298 }
 0x8a8   : > { %v3759_v26 = vpop.f32.mrb[14].mxu0  ;;  %v1403_v31 = vmul.f32 %v3299_v27, %v3295_v13 }
 0x8a9   : > { %v1504_v28 = vpack.c.bf16 %v3759_v26, %v3757_v22  ;;  %v3093_v29 = vpop.f32.mrb[15].mxu0 }
 0x8ab   : > { %v3301_v30 = vpop.eup %3300 }
 0x8ac   : > { %v1404_v32 = vmul.f32 %v3301_v30, %v3297_v16 }
 0x8ae   : > { %v1667_v33 = vpop.f32.mrb[16].mxu0  ;;  %v1407_v34 = vpack.c.bf16 %v1404_v32, %v1403_v31 }
 0x8af   : > { %v3110_v35 = vpop.f32.mrb[17].mxu0  ;;  %v1725_v36 = vsel %vm1117_vm5, %v1667_v33, -inf }
 0x8b0   : > { %v1670_v37 = vpop.f32.mrb[18].mxu0  ;;  %1726 = vmax.xlane.f32.xlu0 %v1725_v36  ;;  %3085 = vmatmul.mubr.msk.bf16.vlgmr.msra.gmra.mrb[16].mxu1 %vm1117_vm5, %v1407_v34  ;;  %v1867_v34 = vld [vmem:[%s3576_s26 + $0x8] sm:$0xf] }
 0x8b1   : > { %v3111_v38 = vpop.f32.mrb[19].mxu0  ;;  %v1728_v39 = vsel %vm1117_vm5, %v1670_v37, -inf  ;;  %3095 = vmatpush3.bf16.msra.mxu1 %v1514_v50  ;;  %v1875_v35 = vsel %vm1512_vm6, %v1867_v34, 0 }
 0x8b2   : > { %3199 = vmatprep.subr.msk.bf16.mxu1 %vm1512_vm6, %v1260_v51 }
 0x8b4   : > { %1729 = vmax.xlane.f32.xlu0 %v1728_v39 }
 0x8b6   : > { %v1718_v40 = vpop.f32.mrb[20].mxu0 }
 0x8b7   : > { %v3116_v41 = vpop.f32.mrb[21].mxu0  ;;  %v1731_v42 = vsel %vm1117_vm5, %v1718_v40, -inf }
 0x8b8   : > { %v1721_v43 = vpop.f32.mrb[22].mxu0  ;;  %1732 = vmax.xlane.f32.xlu0 %v1731_v42 }
 0x8b9   : > { %v3117_v45 = vpop.f32.mrb[23].mxu0  ;;  %v1734_v48 = vsel %vm1117_vm5, %v1721_v43, -inf }
 0x8bc   : > { %1735 = vmax.xlane.f32.xlu0 %v1734_v48 }
 0x93d   : > { %v1727_v52 = vpop.xlane.xlu0 %1726 }
 0x93e   : > { %v1737_v53 = vsub.f32 %v1667_v33, %v1727_v52 }
 0x940   : > { %v1741_v54 = vmul.f32 1.442695, %v1737_v53 }
 0x941   : > { %v1730_v55 = vpop.xlane.xlu0 %1729 }
 0x942   : > { %3302 = vpow2.f32 %v1741_v54  ;;  %v1738_v56 = vsub.f32 %v1670_v37, %v1730_v55 }
 0x944   : > { %v1743_v57 = vmul.f32 1.442695, %v1738_v56 }
 0x945   : > { %v1733_v58 = vpop.xlane.xlu0 %1732 }
 0x946   : > { %3304 = vpow2.f32 %v1743_v57  ;;  %v1739_v59 = vsub.f32 %v1718_v40, %v1733_v58 }
 0x948   : > { %v1745_v60 = vmul.f32 1.442695, %v1739_v59 }
 0x949   : > { %v1736_v61 = vpop.xlane.xlu0 %1735 }
 0x94a   : > { %3306 = vpow2.f32 %v1745_v60  ;;  %v1740_v62 = vsub.f32 %v1721_v43, %v1736_v61 }
 0x94c   : > { %v3303_v63 = vpop.eup %3302  ;;  %v1747_v0 = vmul.f32 1.442695, %v1740_v62 }
 0x94d   : > { %v1749_v1 = vsel %vm1117_vm5, %v3303_v63, 0.0 }
 0x94e   : > { %3308 = vpow2.f32 %v1747_v0  ;;  %1750 = vadd.xlane.f32.xlu1 %v1749_v1 }
 0x950   : > { %v3305_v2 = vpop.eup %3304 }
 0x951   : > { %v1752_v3 = vsel %vm1117_vm5, %v3305_v2, 0.0 }
 0x952   : > { %1753 = vadd.xlane.f32.xlu0 %v1752_v3 }
 0x954   : > { %v3307_v4 = vpop.eup %3306 }
 0x955   : > { %v1755_v5 = vsel %vm1117_vm5, %v3307_v4, 0.0 }
 0x956   : > { %1756 = vadd.xlane.f32.xlu0 %v1755_v5 }
 0x958   : > { %v3309_v6 = vpop.eup %3308 }
 0x959   : > { %v1758_v7 = vsel %vm1117_vm5, %v3309_v6, 0.0 }
 0x95a   : > { %1759 = vadd.xlane.f32.xlu0 %v1758_v7 }
 0x95f   : > { %1818 = vrot.lane.b32.xlu1 %v3661_v23, %s3433_s20 }
 0x970   : > { %1771 = vrot.lane.b32.xlu0 %v3663_v25, %s3433_s20 }
 0x974   : > { %1932 = vrot.lane.b32.xlu0 %v3663_v25, %s3434_s21 }
 0x978   : > { %1983 = vrot.lane.b32.xlu0 %v3661_v23, %s3434_s21 }
 0x97c   : > { %1930 = vrot.lane.b32.xlu0 %v3663_v25, %s3435_s22 }
 0x980   : > { %1981 = vrot.lane.b32.xlu0 %v3661_v23, %s3435_s22 }
 0x983   : > { %v1449_v8 = vpop.f32.mrb[16].mxu1 }
 0x984   : > { %v3086_v9 = vpop.f32.mrb[17].mxu1 }
 0x985   : > { %v1452_v10 = vpop.f32.mrb[18].mxu1 }
 0x986   : > { %v1503_v11 = vpack.c.bf16 %v1452_v10, %v1449_v8  ;;  %v3087_v13 = vpop.f32.mrb[19].mxu1 }
 0x988   : > { %3096 = vmatprep.mubr.msk.bf16.mxu1 %vm1019_vm4, %v1503_v11 }
 0x989   : > { %3097 = vmatmul.mubr.msk.bf16.vlgmr.msra.gmra.mrb[20].mxu1 %vm1019_vm4, %v1504_v28 }
 0x98a   : > { %3102 = vmatprep.mubr.msk.bf16.mxu1 %vm1019_vm4, %v1258_v47  ;;  %3101 = vmatpush3.bf16.msra.mxu1 %v1572_v14 }
 0x98b   : > { %3118 = vmatprep.subr.bf16.mxu1 %v3424_v19 }
 0x995   : > { %3103 = vmatmul.mubr.msk.bf16.vlgmr.msra.gmra.mrb[20].mxu1 %vm1019_vm4, %v1259_v17 }
 0x996   : > { %3120 = vmatprep.mubr.msk.bf16.mxu1 %vm3425_vm3, %v3424_v19 }
 0x9db   : > { %v1751_v16 = vpop.xlane.xlu1 %1750 }
 0x9dc   : > { %3310 = vrcp.f32 %v1751_v16 }
 0x9df   : > { %v1754_v18 = vpop.xlane.xlu0 %1753  ;;  %v1819_v20 = vpop.permute.xlu1 %1818 }
 0x9e0   : > { %3312 = vrcp.f32 %v1754_v18  ;;  %3125 = vmatpush3.bf16.msra.mxu0 %v1819_v20 }
 0x9e1   : > { %3136 = vmatprep.subr.bf16.mxu0 %v3424_v19 }
 0x9e3   : > { %v1757_v44 = vpop.xlane.xlu0 %1756 }
 0x9e4   : > { %3314 = vrcp.f32 %v1757_v44 }
 0x9e6   : > { %v3311_v47 = vpop.eup %3310 }
 0x9e7   : > { %v1760_v46 = vpop.xlane.xlu0 %1759  ;;  %v1765_v12 = vmul.f32 %v3311_v47, %v3303_v63 }
 0x9e8   : > { %3316 = vrcp.f32 %v1760_v46 }
 0x9ea   : > { %v3313_v21 = vpop.eup %3312 }
 0x9eb   : > { %v1766_v15 = vmul.f32 %v3313_v21, %v3305_v2  ;;  %v1772_v17 = vpop.permute.xlu0 %1771 }
 0x9ec   : > { %3119 = vmatpush3.bf16.msra.mxu1 %v1772_v17 }
 0x9ed   : > { %v1769_v22 = vpack.c.bf16 %v1766_v15, %v1765_v12  ;;  %3200 = vmatprep.subr.msk.bf16.mxu1 %vm1512_vm6, %v1867_v34 }
 0x9ee   : > { %v3315_v24 = vpop.eup %3314 }
 0x9ef   : > { %3121 = vmatmul.mubr.msk.bf16.vlgmr.msra.gmra.mrb[24].mxu1 %vm1117_vm5, %v1769_v22  ;;  %v1933_v27 = vpop.permute.xlu0 %1932  ;;  %v1767_v28 = vmul.f32 %v3315_v24, %v3307_v4 }
 0x9f0   : > { %v1938_v31 = vsel %vm1019_vm4, %v1933_v27, 0  ;;  %3131 = vmatpush3.bf16.msra.mxu1 %v1875_v35 }
 0x9f1   : > { %3142 = vmatprep.subr.bf16.mxu1 %v3424_v19 }
 0x9f2   : > { %v3317_v26 = vpop.eup %3316 }
 0x9f3   : > { %v1768_v29 = vmul.f32 %v3317_v26, %v3309_v6  ;;  %v1984_v32 = vpop.permute.xlu0 %1983 }
 0x9f4   : > { %v1989_v49 = vsel %vm1019_vm4, %v1984_v32, 0  ;;  %v2174_v32 = vld [vmem:[%s3576_s26 + $0xc] sm:$0xf] }
 0x9f5   : > { %v1770_v30 = vpack.c.bf16 %v1768_v29, %v1767_v28 }
 0x9f7   : > { %3127 = vmatmul.mubr.msk.bf16.vlgmr.msra.gmra.mrb[24].mxu0 %vm1117_vm5, %v1770_v30  ;;  %v1931_v33 = vpop.permute.xlu0 %1930 }
 0x9f8   : > { %3137 = vmatpush3.bf16.xpose.msra.mxu0 %v1938_v31  ;;  %3138 = vmatprep.mubr.msk.bf16.mxu0 %vm3425_vm3, %v3424_v19 }
 0x9f9   : > { %3148 = vmatprep.subr.bf16.mxu0 %v3424_v19 }
 0x9fb   : > { %v1982_v56 = vpop.permute.xlu0 %1981 }
 0x9ff   : > { %3139 = vmatmul.mubr.msk.bf16.vlgmr.msra.gmra.mrb[28].mxu0 %vm1019_vm4, %v1931_v33  ;;  %v2182_v33 = vsel %vm1512_vm6, %v2174_v32, 0 }
 0xa00   : > { %3150 = vmatprep.mubr.msk.bf16.mxu0 %vm3425_vm3, %v3424_v19 }
 0xac2   : > { %v1811_v36 = vpop.f32.mrb[24].mxu1 }
 0xac3   : > { %v3122_v37 = vpop.f32.mrb[25].mxu1 }
 0xac4   : > { %v1814_v38 = vpop.f32.mrb[26].mxu1 }
 0xac5   : > { %v1865_v39 = vpack.c.bf16 %v1814_v38, %v1811_v36  ;;  %v3123_v40 = vpop.f32.mrb[27].mxu1 }
 0xac7   : > { %3132 = vmatprep.mubr.msk.bf16.mxu1 %vm1019_vm4, %v1865_v39 }
 0xaca   : > { %v1858_v41 = vpop.f32.mrb[24].mxu0 }
 0xacb   : > { %v3128_v42 = vpop.f32.mrb[25].mxu0 }
 0xacc   : > { %v1861_v43 = vpop.f32.mrb[26].mxu0 }
 0xacd   : > { %v1866_v45 = vpack.c.bf16 %v1861_v43, %v1858_v41  ;;  %v3129_v48 = vpop.f32.mrb[27].mxu0 }
 0xace   : > { %v2935_v48 = vld [vmem:[%s4037_s0] ss:$0 sm:$0xff] }
 0xacf   : > { %3133 = vmatmul.mubr.msk.bf16.vlgmr.msra.gmra.mrb[20].mxu1 %vm1019_vm4, %v1866_v45 }
 0xad0   : > { %3143 = vmatpush3.bf16.xpose.msra.mxu1 %v1989_v49  ;;  %3144 = vmatprep.mubr.msk.bf16.mxu1 %vm3425_vm3, %v3424_v19 }
 0xad1   : > { %3154 = vmatprep.subr.bf16.mxu1 %v3424_v19 }
 0xad2   : > { %v1974_v50 = vpop.f32.mrb[28].mxu0 }
 0xad3   : > { %v3140_v51 = vpop.f32.mrb[29].mxu0  ;;  %v2032_v52 = vsel %vm1117_vm5, %v1974_v50, -inf }
 0xad4   : > { %2033 = vmax.xlane.f32.xlu0 %v2032_v52  ;;  %v1977_v53 = vpop.f32.mrb[30].mxu0  ;;  %v3359_v52 = vld [vmem:[#allocation2] sm:$0xff] }
 0xad5   : > { %v3141_v54 = vpop.f32.mrb[31].mxu0  ;;  %v2035_v55 = vsel %vm1117_vm5, %v1977_v53, -inf }
 0xad6   : > { %2036 = vmax.xlane.f32.xlu1 %v2035_v55 }
 0xad7   : > { %3145 = vmatmul.mubr.msk.bf16.vlgmr.msra.gmra.mrb[28].mxu1 %vm1019_vm4, %v1982_v56 }
 0xad8   : > { %3156 = vmatprep.mubr.msk.bf16.mxu1 %vm3425_vm3, %v3424_v19 }
 0xb61   : > { %v2034_v57 = vpop.xlane.xlu0 %2033 }
 0xb62   : > { %v2044_v58 = vsub.f32 %v1974_v50, %v2034_v57  ;;  %v3358_v50 = vld [vmem:[#allocation2 + $0x10] sm:$0xff]  ;;  %v3360_v57 = vld [vmem:[#allocation2 + $0x18] sm:$0xff] }
 0xb63   : > { %v2037_v62 = vpop.xlane.xlu1 %2036 }
 0xb64   : > { %v2048_v59 = vmul.f32 1.442695, %v2044_v58  ;;  %v2045_v63 = vsub.f32 %v1977_v53, %v2037_v62 }
 0xb66   : > { %3318 = vpow2.f32 %v2048_v59  ;;  %v2050_v0 = vmul.f32 1.442695, %v2045_v63  ;;  %v3361_v59 = vld [vmem:[#allocation2 + $0x8] sm:$0xff] }
 0xb68   : > { %3320 = vpow2.f32 %v2050_v0 }
 0xb70   : > { %v3319_v60 = vpop.eup %3318 }
 0xb71   : > { %v2056_v61 = vsel %vm1117_vm5, %v3319_v60, 0.0 }
 0xb72   : > { %2057 = vadd.xlane.f32.xlu1 %v2056_v61  ;;  %v3321_v6 = vpop.eup %3320 }
 0xb73   : > { %v2059_v7 = vsel %vm1117_vm5, %v3321_v6, 0.0 }
 0xbaa   : > { %v2025_v1 = vpop.f32.mrb[28].mxu1 }
 0xbab   : > { %v3146_v2 = vpop.f32.mrb[29].mxu1  ;;  %v2038_v3 = vsel %vm1117_vm5, %v2025_v1, -inf }
 0xbac   : > { %v2028_v4 = vpop.f32.mrb[30].mxu1  ;;  %2039 = vmax.xlane.f32.xlu0 %v2038_v3 }
 0xbad   : > { %v3147_v5 = vpop.f32.mrb[31].mxu1  ;;  %v2041_v19 = vsel %vm1117_vm5, %v2028_v4, -inf }
 0xbb0   : > { %2042 = vmax.xlane.f32.xlu0 %v2041_v19 }
 0xbb4   : > { %2060 = vadd.xlane.f32.xlu0 %v2059_v7 }
 0xbff   : > { %v2058_v47 = vpop.xlane.xlu1 %2057 }
 0xc39   : > { %v2040_v8 = vpop.xlane.xlu0 %2039 }
 0xc3a   : > { %v2046_v9 = vsub.f32 %v2025_v1, %v2040_v8 }
 0xc3c   : > { %v2052_v10 = vmul.f32 1.442695, %v2046_v9 }
 0xc3d   : > { %v2043_v11 = vpop.xlane.xlu0 %2042 }
 0xc3e   : > { %3322 = vpow2.f32 %v2052_v10  ;;  %v2047_v13 = vsub.f32 %v2028_v4, %v2043_v11 }
 0xc40   : > { %v2054_v14 = vmul.f32 1.442695, %v2047_v13 }
 0xc41   : > { %v2061_v46 = vpop.xlane.xlu0 %2060 }
 0xc42   : > { %3324 = vpow2.f32 %v2054_v14 }
 0xc43   : > { %3326 = vrcp.f32 %v2061_v46 }
 0xc44   : > { %3328 = vrcp.f32 %v2058_v47 }
 0xc48   : > { %v3323_v16 = vpop.eup %3322 }
 0xc49   : > { %v2062_v18 = vsel %vm1117_vm5, %v3323_v16, 0.0 }
 0xc4a   : > { %2063 = vadd.xlane.f32.xlu1 %v2062_v18 }
 0xc4c   : > { %v3325_v20 = vpop.eup %3324 }
 0xc4d   : > { %v2065_v44 = vsel %vm1117_vm5, %v3325_v20, 0.0  ;;  %v3327_v21 = vpop.eup %3326 }
 0xc4e   : > { %2066 = vadd.xlane.f32.xlu0 %v2065_v44  ;;  %v3329_v15 = vpop.eup %3328  ;;  %v2073_v17 = vmul.f32 %v3327_v21, %v3321_v6 }
 0xc4f   : > { %v2072_v22 = vmul.f32 %v3329_v15, %v3319_v60 }
 0xc51   : > { %v2076_v27 = vpack.c.bf16 %v2073_v17, %v2072_v22  ;;  %v3256_v17 = vld [vmem:[%s3589_s27] sm:$0xff]   ;;  %v3257_v22 = vld [vmem:[%s3589_s27 + $0x8] sm:$0xff]  }
 0xc5b   : > { %2078 = vrot.lane.b32.xlu1 %v3663_v25, %s3436_s23 }
 0xc64   : > { %2125 = vrot.lane.b32.xlu0 %v3661_v23, %s3436_s23 }
 0xcd7   : > { %v2064_v12 = vpop.xlane.xlu1 %2063 }
 0xcd8   : > { %3330 = vrcp.f32 %v2064_v12 }
 0xcdb   : > { %v2067_v24 = vpop.xlane.xlu0 %2066  ;;  %v2079_v26 = vpop.permute.xlu1 %2078 }
 0xcdc   : > { %3332 = vrcp.f32 %v2067_v24  ;;  %3149 = vmatpush3.bf16.msra.mxu0 %v2079_v26 }
 0xcdd   : > { %3166 = vmatprep.subr.bf16.mxu0 %v3256_v17 }
 0xcdf   : > { %v2126_v28 = vpop.permute.xlu0 %2125  ;;  %3151 = vmatmul.mubr.msk.bf16.vlgmr.msra.gmra.mrb[32].mxu0 %vm1117_vm5, %v2076_v27 }
 0xce0   : > { %3155 = vmatpush3.bf16.msra.mxu1 %v2126_v28  ;;  %3167 = vmatpush3.bf16.msra.mxu0 %v3256_v17 }
 0xce1   : > { %3201 = vmatprep.subr.msk.bf16.mxu1 %vm1512_vm6, %v2174_v32  ;;  %3168 = vmatprep.subr.bf16.mxu0 %v3257_v22 }
 0xce2   : > { %v3331_v23 = vpop.eup %3330 }
 0xce3   : > { %v2074_v29 = vmul.f32 %v3331_v23, %v3323_v16 }
 0xce4   : > { %3169 = vmatpush3.bf16.msra.mxu0 %v3257_v22 }
 0xce6   : > { %v3333_v25 = vpop.eup %3332 }
 0xce7   : > { %v2075_v30 = vmul.f32 %v3333_v25, %v3325_v20 }
 0xce9   : > { %v2077_v31 = vpack.c.bf16 %v2075_v30, %v2074_v29 }
 0xceb   : > { %3157 = vmatmul.mubr.msk.bf16.vlgmr.msra.gmra.mrb[32].mxu1 %vm1117_vm5, %v2077_v31 }
 0xcec   : > { %3161 = vmatpush3.bf16.msra.mxu1 %v2182_v33 }
 0xdb2   : > { %v2118_v34 = vpop.f32.mrb[32].mxu0 }
 0xdb3   : > { %v3152_v35 = vpop.f32.mrb[33].mxu0 }
 0xdb4   : > { %v2121_v36 = vpop.f32.mrb[34].mxu0 }
 0xdb5   : > { %v2172_v37 = vpack.c.bf16 %v2121_v36, %v2118_v34  ;;  %v3153_v38 = vpop.f32.mrb[35].mxu0  ;;  %v2936_v36 = vld [vmem:[%s4038_s25] ss:$0 sm:$0xff] }
 0xdb7   : > { %3162 = vmatprep.mubr.msk.bf16.mxu1 %vm1019_vm4, %v2172_v37 }
 0xdbe   : > { %v2165_v39 = vpop.f32.mrb[32].mxu1 }
 0xdbf   : > { %v3158_v40 = vpop.f32.mrb[33].mxu1 }
 0xdc0   : > { %v2168_v41 = vpop.f32.mrb[34].mxu1 }
 0xdc1   : > { %v2173_v42 = vpack.c.bf16 %v2168_v41, %v2165_v39  ;;  %v3159_v43 = vpop.f32.mrb[35].mxu1 }
 0xdc3   : > { %3163 = vmatmul.mubr.msk.bf16.vlgmr.msra.gmra.mrb[20].mxu1 %vm1019_vm4, %v2173_v42  ;;  %v2937_v42 = vld [vmem:[%s718_s15] ss:$0 sm:$0xff] }
 0xe96   : > { %v3164_v45 = vpop.f32.mrb[20].mxu1 }
 0xe97   : > { %v2218_v49 = vpop.f32.mrb[21].mxu1  ;;  %v2239_v51 = vadd.f32 %v3358_v50, %v3164_v45 }
 0xe98   : > { %v2237_v53 = vadd.f32 %v3359_v52, %v2218_v49  ;;  %v3165_v54 = vpop.f32.mrb[22].mxu1 }
 0xe99   : > { %v2221_v55 = vpop.f32.mrb[23].mxu1  ;;  %v2240_v58 = vadd.f32 %v3360_v57, %v3165_v54  ;;  %v3847_v61 = vadd.f32 %v2935_v48, %v2239_v51 }
 0xe9a   : > { %v3845_v56 = vadd.f32 %v2935_v48, %v2237_v53  ;;  %v2238_v60 = vadd.f32 %v3361_v59, %v2221_v55  ;;  %v3258_v59 = vld [vmem:[%s3603_s19] sm:$0xff]  }
 0xe9b   : > { %v3853_v0 = vadd.f32 %v2935_v48, %v2240_v58  ;;  %v2260_v2 = vsel %vm867_vm2, %v3847_v61, 0.0  ;;  %3174 = vmatprep.subr.bf16.mxu0 %v3258_v59 }
 0xe9c   : > { %v3849_v62 = vadd.f32 %v2935_v48, %v2238_v60  ;;  %v2254_v63 = vsel %vm867_vm2, %v3845_v56, 0.0  ;;  %v3259_v60 = vld [vmem:[%s3603_s19 + $0x8] sm:$0xff]  }
 0xe9d   : > { %2255 = vadd.xlane.f32.xlu1 %v2254_v63  ;;  %v2263_v3 = vsel %vm867_vm2, %v3853_v0, 0.0  ;;  %v3260_v63 = vld [vmem:[%s3603_s19 + $0x10] sm:$0xff]  }
 0xe9e   : > { %v2257_v1 = vsel %vm867_vm2, %v3849_v62, 0.0 }
 0xe9f   : > { %2258 = vadd.xlane.f32.xlu0 %v2257_v1  ;;  %v3261_v1 = vld [vmem:[%s3603_s19 + $0x18] sm:$0xff]  }
 0xea1   : > { %2261 = vadd.xlane.f32.xlu1 %v2260_v2  ;;  %v2938_v2 = vld [vmem:[%s726_s6] ss:$0 sm:$0xff] }
 0xea3   : > { %2264 = vadd.xlane.f32.xlu0 %v2263_v3 }
 0xf2a   : > { %v2256_v4 = vpop.xlane.xlu1 %2255 }
 0xf2b   : > { %v2266_v5 = vmul.f32 0.03125, %v2256_v4 }
 0xf2c   : > { %v2259_v19 = vpop.xlane.xlu0 %2258 }
 0xf2d   : > { %v2270_v6 = vsub.f32 %v3845_v56, %v2266_v5  ;;  %v2267_v7 = vmul.f32 0.03125, %v2259_v19 }
 0xf2e   : > { %v2262_v8 = vpop.xlane.xlu1 %2261 }
 0xf2f   : > { %v2271_v9 = vsub.f32 %v3849_v62, %v2267_v7  ;;  %v2268_v10 = vmul.f32 0.03125, %v2262_v8  ;;  %v2274_v11 = vmul.f32 %v2270_v6, %v2270_v6 }
 0xf30   : > { %v2265_v13 = vpop.xlane.xlu0 %2264 }
 0xf31   : > { %v2272_v14 = vsub.f32 %v3847_v61, %v2268_v10  ;;  %v2269_v16 = vmul.f32 0.03125, %v2265_v13  ;;  %v2278_v18 = vsel %vm867_vm2, %v2274_v11, 0.0  ;;  %v2275_v20 = vmul.f32 %v2271_v9, %v2271_v9 }
 0xf32   : > { %2279 = vadd.xlane.f32.xlu1 %v2278_v18 }
 0xf33   : > { %v2273_v44 = vsub.f32 %v3853_v0, %v2269_v16  ;;  %v2281_v46 = vsel %vm867_vm2, %v2275_v20, 0.0  ;;  %v2276_v47 = vmul.f32 %v2272_v14, %v2272_v14 }
 0xf34   : > { %2282 = vadd.xlane.f32.xlu0 %v2281_v46 }
 0xf35   : > { %v2284_v21 = vsel %vm867_vm2, %v2276_v47, 0.0  ;;  %v2277_v12 = vmul.f32 %v2273_v44, %v2273_v44 }
 0xf36   : > { %2285 = vadd.xlane.f32.xlu1 %v2284_v21 }
 0xf37   : > { %v2287_v15 = vsel %vm867_vm2, %v2277_v12, 0.0 }
 0xf38   : > { %2288 = vadd.xlane.f32.xlu0 %v2287_v15 }
 0xfbf   : > { %v2280_v24 = vpop.xlane.xlu1 %2279 }
 0xfc0   : > { %v2290_v26 = vmul.f32 0.03125, %v2280_v24 }
 0xfc1   : > { %v2283_v27 = vpop.xlane.xlu0 %2282 }
 0xfc2   : > { %v2294_v28 = vadd.f32 1e-05, %v2290_v26  ;;  %v2291_v23 = vmul.f32 0.03125, %v2283_v27 }
 0xfc3   : > { %v2286_v25 = vpop.xlane.xlu1 %2285 }
 0xfc4   : > { %3334 = vrsqrt.f32 %v2294_v28  ;;  %v2295_v29 = vadd.f32 1e-05, %v2291_v23  ;;  %v2292_v30 = vmul.f32 0.03125, %v2286_v25 }
 0xfc5   : > { %v2289_v31 = vpop.xlane.xlu0 %2288 }
 0xfc6   : > { %3336 = vrsqrt.f32 %v2295_v29  ;;  %v2296_v32 = vadd.f32 1e-05, %v2292_v30  ;;  %v2293_v33 = vmul.f32 0.03125, %v2289_v31 }
 0xfc8   : > { %3338 = vrsqrt.f32 %v2296_v32  ;;  %v2297_v34 = vadd.f32 1e-05, %v2293_v33 }
 0xfca   : > { %3340 = vrsqrt.f32 %v2297_v34 }
 0xfce   : > { %v3335_v35 = vpop.eup %3334 }
 0xfcf   : > { %v2302_v37 = vmul.f32 %v3335_v35, %v2270_v6 }
 0xfd0   : > { %v3337_v38 = vpop.eup %3336 }
 0xfd1   : > { %v2303_v39 = vmul.f32 %v3337_v38, %v2271_v9  ;;  %v2312_v40 = vmul.f32 %v2936_v36, %v2302_v37 }
 0xfd2   : > { %v3339_v41 = vpop.eup %3338 }
 0xfd3   : > { %v2304_v43 = vmul.f32 %v3339_v41, %v2272_v14  ;;  %v2313_v45 = vmul.f32 %v2936_v36, %v2303_v39  ;;  %v2322_v51 = vadd.f32 %v2937_v42, %v2312_v40 }
 0xfd4   : > { %v3341_v48 = vpop.eup %3340 }
 0xfd5   : > { %v2314_v49 = vmul.f32 %v2936_v36, %v2304_v43  ;;  %v2305_v50 = vmul.f32 %v3341_v48, %v2273_v44  ;;  %v2323_v52 = vadd.f32 %v2937_v42, %v2313_v45 }
 0xfd7   : > { %v2315_v53 = vmul.f32 %v2936_v36, %v2305_v50  ;;  %v2326_v54 = vpack.c.bf16 %v2323_v52, %v2322_v51  ;;  %v2324_v55 = vadd.f32 %v2937_v42, %v2314_v49 }
 0xfd9   : > { %3170 = vmatprep.mubr.msk.bf16.mxu0 %vm867_vm2, %v2326_v54  ;;  %v2325_v57 = vadd.f32 %v2937_v42, %v2315_v53 }
 0xfdb   : > { %v2327_v58 = vpack.c.bf16 %v2325_v57, %v2324_v55 }
 0xfdd   : > { %3171 = vmatmul.mubr.msk.bf16.vlgmr.msra.gmra.mrb[36].mxu0 %vm867_vm2, %v2327_v58 }
 0xfde   : > { %3175 = vmatpush3.bf16.msra.mxu0 %v3258_v59 }
 0xfdf   : > { %3176 = vmatprep.subr.bf16.mxu0 %v3259_v60 }
 0xfe2   : > { %3177 = vmatpush3.bf16.msra.mxu0 %v3259_v60 }
 0xfe3   : > { %3178 = vmatprep.subr.bf16.mxu0 %v3260_v63 }
 0xfe6   : > { %3179 = vmatpush3.bf16.msra.mxu0 %v3260_v63 }
 0xfe7   : > { %3180 = vmatprep.subr.bf16.mxu0 %v3261_v1 }
 0xfea   : > { %3181 = vmatpush3.bf16.msra.mxu0 %v3261_v1 }
0x10b0   : > { %v3172_v3 = vpop.f32.mrb[36].mxu0 }
0x10b1   : > { %v3892_v4 = vadd.f32 %v3172_v3, %v2938_v2  ;;  %v2391_v5 = vpop.f32.mrb[37].mxu0 }
0x10b2   : > { %v3894_v19 = vadd.f32 %v2938_v2, %v2391_v5  ;;  %v3173_v6 = vpop.f32.mrb[38].mxu0 }
0x10b3   : > { %v3897_v7 = vmul.f32 0.70710677, %v3892_v4  ;;  %v3899_v8 = vadd.f32 %v3173_v6, %v2938_v2  ;;  %v2394_v9 = vpop.f32.mrb[39].mxu0 }
0x10b4   : > { %v3902_v10 = vmul.f32 0.70710677, %v3894_v19  ;;  %v3904_v11 = vadd.f32 %v2938_v2, %v2394_v9 }
0x10b5   : > { %v2416_v13 = vand.u32 2147483647, %v3897_v7  ;;  %v3908_v14 = vmul.f32 0.70710677, %v3899_v8  ;;  %vm2496_vm7 = vcmp.lt.f32.partialorder %v3897_v7, 0.0 }
0x10b6   : > { %v2414_v16 = vand.u32 2147483647, %v3902_v10  ;;  %v3912_v18 = vmul.f32 0.70710677, %v3904_v11  ;;  %vm2494_vm8 = vcmp.lt.f32.partialorder %v3902_v10, 0.0 }
0x10b7   : > { %v2420_v20 = vmul.f32 0.3275911, %v2416_v13  ;;  %v2417_v44 = vand.u32 2147483647, %v3908_v14  ;;  %v2472_v26 = vsub.f32 0.0, %v2416_v13  ;;  %vm2497_vm9 = vcmp.lt.f32.partialorder %v3908_v14, 0.0 }
0x10b8   : > { %v2418_v46 = vmul.f32 0.3275911, %v2414_v16  ;;  %v2415_v47 = vand.u32 2147483647, %v3912_v18  ;;  %v2470_v27 = vsub.f32 0.0, %v2414_v16  ;;  %vm2495_vm10 = vcmp.lt.f32.partialorder %v3912_v18, 0.0 }
0x10b9   : > { %v2424_v21 = vadd.f32 1.0, %v2420_v20  ;;  %v2421_v12 = vmul.f32 0.3275911, %v2417_v44  ;;  %v2476_v23 = vmul.f32 %v2472_v26, %v2416_v13  ;;  %v2473_v25 = vsub.f32 0.0, %v2417_v44 }
0x10ba   : > { %v2422_v15 = vadd.f32 1.0, %v2418_v46  ;;  %v2419_v17 = vmul.f32 0.3275911, %v2415_v47  ;;  %v2474_v31 = vmul.f32 %v2470_v27, %v2414_v16  ;;  %v2471_v33 = vsub.f32 0.0, %v2415_v47 }
0x10bb   : > { %3342 = vrcp.f32 %v2424_v21  ;;  %v2425_v22 = vadd.f32 1.0, %v2421_v12  ;;  %v2482_v36 = vmul.f32 1.442695, %v2476_v23  ;;  %v2477_v38 = vmul.f32 %v2473_v25, %v2417_v44 }
0x10bc   : > { %3344 = vrcp.f32 %v2422_v15  ;;  %v2423_v24 = vadd.f32 1.0, %v2419_v17  ;;  %v2478_v40 = vmul.f32 1.442695, %v2474_v31  ;;  %v2475_v45 = vmul.f32 %v2471_v33, %v2415_v47 }
0x10bd   : > { %3346 = vrcp.f32 %v2425_v22  ;;  %v2484_v52 = vmul.f32 1.442695, %v2477_v38 }
0x10be   : > { %3348 = vrcp.f32 %v2423_v24  ;;  %v2480_v58 = vmul.f32 1.442695, %v2475_v45 }
0x10bf   : > { %3350 = vpow2.f32 %v2482_v36 }
0x10c0   : > { %3352 = vpow2.f32 %v2478_v40 }
0x10c1   : > { %3354 = vpow2.f32 %v2484_v52 }
0x10c2   : > { %3356 = vpow2.f32 %v2480_v58 }
0x10c5   : > { %v3343_v28 = vpop.eup %3342 }
0x10c6   : > { %v3345_v29 = vpop.eup %3344  ;;  %v2436_v30 = vmul.f32 1.0614054, %v3343_v28 }
0x10c7   : > { %v2434_v32 = vmul.f32 1.0614054, %v3345_v29  ;;  %v3347_v35 = vpop.eup %3346 }
0x10c8   : > { %v2440_v34 = vadd.f32 -1.4531521, %v2436_v30  ;;  %v2437_v41 = vmul.f32 1.0614054, %v3347_v35  ;;  %v3349_v42 = vpop.eup %3348 }
0x10c9   : > { %v2438_v37 = vadd.f32 -1.4531521, %v2434_v32  ;;  %v2435_v50 = vmul.f32 1.0614054, %v3349_v42  ;;  %v3351_v21 = vpop.eup %3350 }
0x10ca   : > { %v2444_v39 = vmul.f32 %v3343_v28, %v2440_v34  ;;  %v2441_v49 = vadd.f32 -1.4531521, %v2437_v41  ;;  %v3353_v15 = vpop.eup %3352 }
0x10cb   : > { %v2442_v43 = vmul.f32 %v3345_v29, %v2438_v37  ;;  %v2439_v55 = vadd.f32 -1.4531521, %v2435_v50  ;;  %v3355_v30 = vpop.eup %3354  ;;  %v2406_v50 = vmul.f32 0.5, %v3894_v19 }
0x10cc   : > { %v2448_v48 = vadd.f32 1.4214138, %v2444_v39  ;;  %v2445_v54 = vmul.f32 %v3347_v35, %v2441_v49  ;;  %v3357_v36 = vpop.eup %3356  ;;  %v2409_v49 = vmul.f32 0.5, %v3899_v8  ;;  %v2943_v8 = vld [vmem:[%s734_s8] ss:$0 sm:$0xff] }
0x10cd   : > { %v2446_v51 = vadd.f32 1.4214138, %v2442_v43  ;;  %v2443_v63 = vmul.f32 %v3349_v42, %v2439_v55 }
0x10ce   : > { %v2452_v53 = vmul.f32 %v3343_v28, %v2448_v48  ;;  %v2449_v60 = vadd.f32 1.4214138, %v2445_v54 }
0x10cf   : > { %v2450_v57 = vmul.f32 %v3345_v29, %v2446_v51  ;;  %v2447_v5 = vadd.f32 1.4214138, %v2443_v63 }
0x10d0   : > { %v2456_v59 = vadd.f32 -0.28449672, %v2452_v53  ;;  %v2453_v3 = vmul.f32 %v3347_v35, %v2449_v60  ;;  %v2407_v53 = vmul.f32 0.5, %v3904_v11 }
0x10d1   : > { %v2454_v1 = vadd.f32 -0.28449672, %v2450_v57  ;;  %v2451_v16 = vmul.f32 %v3349_v42, %v2447_v5 }
0x10d2   : > { %v2460_v2 = vmul.f32 %v3343_v28, %v2456_v59  ;;  %v2457_v13 = vadd.f32 -0.28449672, %v2453_v3 }
0x10d3   : > { %v2458_v6 = vmul.f32 %v3345_v29, %v2454_v1  ;;  %v2455_v47 = vadd.f32 -0.28449672, %v2451_v16 }
0x10d4   : > { %v2464_v9 = vadd.f32 0.2548296, %v2460_v2  ;;  %v2461_v46 = vmul.f32 %v3347_v35, %v2457_v13 }
0x10d5   : > { %v2462_v20 = vadd.f32 0.2548296, %v2458_v6  ;;  %v2459_v24 = vmul.f32 %v3349_v42, %v2455_v47 }
0x10d6   : > { %v2468_v44 = vmul.f32 %v3343_v28, %v2464_v9  ;;  %v2465_v22 = vadd.f32 0.2548296, %v2461_v46 }
0x10d7   : > { %v2466_v12 = vmul.f32 %v3345_v29, %v2462_v20  ;;  %v2463_v25 = vadd.f32 0.2548296, %v2459_v24 }
0x10d8   : > { %v2488_v17 = vmul.f32 %v3351_v21, %v2468_v44  ;;  %v2469_v23 = vmul.f32 %v3347_v35, %v2465_v22  ;;  %v2408_v35 = vmul.f32 0.5, %v3892_v4 }
0x10d9   : > { %v2486_v26 = vmul.f32 %v3353_v15, %v2466_v12  ;;  %v2467_v34 = vmul.f32 %v3349_v42, %v2463_v25 }
0x10da   : > { %v2492_v27 = vsub.f32 1.0, %v2488_v17  ;;  %v2489_v33 = vmul.f32 %v3355_v30, %v2469_v23 }
0x10db   : > { %v2490_v31 = vsub.f32 1.0, %v2486_v26  ;;  %v2487_v29 = vmul.f32 %v3357_v36, %v2467_v34 }
0x10dc   : > { %v2500_v32 = vsub.f32 0.0, %v2492_v27  ;;  %v2493_v38 = vsub.f32 1.0, %v2489_v33 }
0x10dd   : > { %v2498_v28 = vsub.f32 0.0, %v2490_v31  ;;  %v2491_v41 = vsub.f32 1.0, %v2487_v29 }
0x10de   : > { %v2504_v37 = vsel %vm2496_vm7, %v2500_v32, %v2492_v27  ;;  %v2501_v40 = vsub.f32 0.0, %v2493_v38 }
0x10df   : > { %v2502_v39 = vsel %vm2494_vm8, %v2498_v28, %v2490_v31  ;;  %v2508_v43 = vadd.f32 1.0, %v2504_v37  ;;  %v2499_v48 = vsub.f32 0.0, %v2491_v41 }
0x10e0   : > { %v2505_v45 = vsel %vm2497_vm9, %v2501_v40, %v2493_v38  ;;  %v2506_v42 = vadd.f32 1.0, %v2502_v39 }
0x10e1   : > { %v2509_v7 = vadd.f32 1.0, %v2505_v45  ;;  %v2503_v10 = vsel %vm2495_vm10, %v2499_v48, %v2491_v41  ;;  %v2512_v51 = vmul.f32 %v2508_v43, %v2408_v35 }
0x10e2   : > { %v2507_v54 = vadd.f32 1.0, %v2503_v10  ;;  %v2510_v14 = vmul.f32 %v2506_v42, %v2406_v50 }
0x10e3   : > { %v2513_v52 = vmul.f32 %v2509_v7, %v2409_v49 }
0x10e4   : > { %v2511_v4 = vmul.f32 %v2507_v54, %v2407_v53 }
0x10e5   : > { %v2515_v55 = vpack.c.bf16 %v2513_v52, %v2512_v51 }
0x10e6   : > { %v2514_v57 = vpack.c.bf16 %v2511_v4, %v2510_v14 }
0x10e8   : > { %3182 = vmatprep.mubr.msk.bf16.mxu0 %vm2555_vm11, %v2514_v57 }
0x10e9   : > { %3183 = vmatmul.mubr.msk.bf16.vlgmr.msra.gmra.mrb[40].mxu0 %vm2555_vm11, %v2515_v55 }
0x11bc   : > { %v3184_v18 = vpop.f32.mrb[40].mxu0  ;;  %2618 = sbr.rel (%p2950_p6) target bundleno = 4549 (0x11c5), region = 96 }
0x11bd   : > { %v2605_v19 = vadd.f32 %v3184_v18, %v2943_v8  ;;  %v2596_v58 = vpop.f32.mrb[41].mxu0 }
0x11be   : > { %v2597_v59 = vadd.f32 %v2943_v8, %v2596_v58  ;;  %v3185_v60 = vpop.f32.mrb[42].mxu0 }
0x11bf   : > { %v2613_v11 = vadd.f32 %v2605_v19, %v3847_v61  ;;  %v2608_v63 = vadd.f32 %v3185_v60, %v2943_v8  ;;  %v2599_v1 = vpop.f32.mrb[43].mxu0 }
0x11c0   : > { %v2611_v2 = vadd.f32 %v2597_v59, %v3845_v56  ;;  %v2600_v3 = vadd.f32 %v2943_v8, %v2599_v1 }
0x11c1   : > { %v2614_v5 = vadd.f32 %v2608_v63, %v3853_v0  ;;  %2621 = vst.msk [vmem:[#allocation2 + $0x10] sm:$0xff] (!%p2950_p6), %vm867_vm2, %v2613_v11 }
0x11c2   : > { %v2612_v6 = vadd.f32 %v2600_v3, %v3849_v62  ;;  %2619 = vst.msk [vmem:[#allocation2] sm:$0xff] (!%p2950_p6), %vm867_vm2, %v2611_v2 }
0x11c3   : > { %2622 = vst.msk [vmem:[#allocation2 + $0x18] sm:$0xff] %vm867_vm2, %v2614_v5 }
0x11c4   : > { %2620 = vst.msk [vmem:[#allocation2 + $0x8] sm:$0xff] %vm867_vm2, %v2612_v6 }
0x11c5 PF: > { %p2951_p7 = scmp.ne.s32.totalorder %s3414_s24, 1 }
0x11c6   : > { %v2629_v56 = vsel (!%p2951_p7), %vm867_vm2, %v2611_v2, 0.0  ;;  %v2635_v61 = vsel (!%p2951_p7), %vm867_vm2, %v2613_v11, 0.0  ;;  %v2632_v62 = vsel (!%p2951_p7), %vm867_vm2, %v2612_v6, 0.0  ;;  %v2638_v0 = vsel (!%p2951_p7), %vm867_vm2, %v2614_v5, 0.0  ;;  %s4039_s29 = sld [smem:[#allocation13_spill]] (!%p2951_p7)  ;;  %s4040_s23 = sld [smem:[#allocation14_spill]] (!%p2951_p7) }
0x11c7   : > { %2626 = sbr.rel (%p2951_p7) target bundleno = 4872 (0x1308), region = 100  ;;  %2630 = vadd.xlane.f32.xlu0 (!%p2951_p7), %v2629_v56  ;;  %2636 = vadd.xlane.f32.xlu1 (!%p2951_p7), %v2635_v61 }
0x11cb   : > { %2633 = vadd.xlane.f32.xlu0 (!%p2951_p7), %v2632_v62  ;;  %2639 = vadd.xlane.f32.xlu1 (!%p2951_p7), %v2638_v0 }
0x11cc   : > { %v2952_v48 = vld [vmem:[%s4039_s29] ss:$0 sm:$0xff] (!%p2951_p7) }
0x11cd   : > { %v2953_v49 = vld [vmem:[%s4040_s23] ss:$0 sm:$0xff] (!%p2951_p7) }
0x1254   : > { %v2631_v9 = vpop.xlane.xlu0 %2630  ;;  %v2637_v13 = vpop.xlane.xlu1 %2636 }
0x1255   : > { %v2641_v16 = vmul.f32 0.03125, %v2631_v9  ;;  %v2643_v20 = vmul.f32 0.03125, %v2637_v13 }
0x1257   : > { %v2645_v44 = vsub.f32 %v2611_v2, %v2641_v16  ;;  %v2647_v46 = vsub.f32 %v2613_v11, %v2643_v20 }
0x1258   : > { %v2634_v47 = vpop.xlane.xlu0 %2633  ;;  %v2640_v21 = vpop.xlane.xlu1 %2639 }
0x1259   : > { %v2642_v12 = vmul.f32 0.03125, %v2634_v47  ;;  %v2644_v15 = vmul.f32 0.03125, %v2640_v21  ;;  %v2649_v17 = vmul.f32 %v2645_v44, %v2645_v44  ;;  %v2651_v22 = vmul.f32 %v2647_v46, %v2647_v46 }
0x125b   : > { %v2646_v24 = vsub.f32 %v2612_v6, %v2642_v12  ;;  %v2648_v26 = vsub.f32 %v2614_v5, %v2644_v15  ;;  %v2653_v27 = vsel %vm867_vm2, %v2649_v17, 0.0  ;;  %v2659_v23 = vsel %vm867_vm2, %v2651_v22, 0.0 }
0x125c   : > { %2654 = vadd.xlane.f32.xlu0 %v2653_v27 }
0x125d   : > { %v2650_v25 = vmul.f32 %v2646_v24, %v2646_v24  ;;  %v2652_v30 = vmul.f32 %v2648_v26, %v2648_v26 }
0x125f   : > { %v2656_v31 = vsel %vm867_vm2, %v2650_v25, 0.0  ;;  %v2662_v32 = vsel %vm867_vm2, %v2652_v30, 0.0 }
0x1260   : > { %2660 = vadd.xlane.f32.xlu0 %v2659_v23  ;;  %2657 = vadd.xlane.f32.xlu1 %v2656_v31 }
0x1264   : > { %2663 = vadd.xlane.f32.xlu1 %v2662_v32 }
0x12e9   : > { %v2655_v33 = vpop.xlane.xlu0 %2654 }
0x12ea   : > { %v2665_v34 = vmul.f32 0.03125, %v2655_v33 }
0x12ec   : > { %v2669_v36 = vadd.f32 1e-05, %v2665_v34 }
0x12ed   : > { %v2658_v28 = vpop.xlane.xlu1 %2657  ;;  %v2661_v37 = vpop.xlane.xlu0 %2660 }
0x12ee   : > { %3362 = vrsqrt.f32 %v2669_v36  ;;  %v2666_v38 = vmul.f32 0.03125, %v2658_v28  ;;  %v2667_v29 = vmul.f32 0.03125, %v2661_v37 }
0x12f0   : > { %v2670_v39 = vadd.f32 1e-05, %v2666_v38  ;;  %v2671_v40 = vadd.f32 1e-05, %v2667_v29 }
0x12f1   : > { %v2664_v41 = vpop.xlane.xlu1 %2663 }
0x12f2   : > { %3364 = vrsqrt.f32 %v2670_v39  ;;  %v2668_v43 = vmul.f32 0.03125, %v2664_v41 }
0x12f3   : > { %3366 = vrsqrt.f32 %v2671_v40 }
0x12f4   : > { %v2672_v35 = vadd.f32 1e-05, %v2668_v43 }
0x12f6   : > { %3368 = vrsqrt.f32 %v2672_v35 }
0x12f8   : > { %v3363_v45 = vpop.eup %3362 }
0x12f9   : > { %v2677_v42 = vmul.f32 %v3363_v45, %v2645_v44 }
0x12fb   : > { %v2687_v7 = vmul.f32 %v2952_v48, %v2677_v42 }
0x12fc   : > { %v3365_v50 = vpop.eup %3364 }
0x12fd   : > { %v3367_v10 = vpop.eup %3366  ;;  %v2697_v51 = vadd.f32 %v2953_v49, %v2687_v7  ;;  %v2678_v52 = vmul.f32 %v3365_v50, %v2646_v24 }
0x12fe   : > { %v2679_v53 = vmul.f32 %v3367_v10, %v2647_v46 }
0x12ff   : > { %2701 = vst.msk [vmem:[#allocation2] sm:$0xff] %vm867_vm2, %v2697_v51  ;;  %v2688_v54 = vmul.f32 %v2952_v48, %v2678_v52 }
0x1300   : > { %v3369_v14 = vpop.eup %3368  ;;  %v2689_v55 = vmul.f32 %v2952_v48, %v2679_v53 }
0x1301   : > { %v2698_v4 = vadd.f32 %v2953_v49, %v2688_v54  ;;  %v2680_v57 = vmul.f32 %v3369_v14, %v2648_v26 }
0x1302   : > { %v2699_v8 = vadd.f32 %v2953_v49, %v2689_v55 }
0x1303   : > { %2702 = vst.msk [vmem:[#allocation2 + $0x8] sm:$0xff] %vm867_vm2, %v2698_v4  ;;  %v2690_v18 = vmul.f32 %v2952_v48, %v2680_v57 }
0x1304   : > { %2703 = vst.msk [vmem:[#allocation2 + $0x10] sm:$0xff] %vm867_vm2, %v2699_v8 }
0x1305   : > { %v2700_v19 = vadd.f32 %v2953_v49, %v2690_v18 }
0x1307   : > { %2704 = vst.msk [vmem:[#allocation2 + $0x18] sm:$0xff] %vm867_vm2, %v2700_v19 }
0x1308 PF: > { %s4041_s26 = sld [smem:[#allocation6_spill]]  ;;  %s3437_s0 = smov [#allocation2]  }
0x1309   : > { %s2715_s27 = sshll.u32 %s3437_s0, 4  ;;  %s2716_s27 = int_to_ptr.vmem [resolvable:$true] %s2715_s27 }
0x130a   : > { %s3370_s17 = scalar_lea.vmem %s2716_s27, 512  ;;  %p3377_p12 = scmp.lt.s32.totalorder %s2716_s27, %s2716_s27 }
0x130b   : > { %p3371_p9 = scmp.ne.s32.totalorder %s2716_s27, %s3370_s17  ;;  %p3378_p13 = scmp.lt.s32.totalorder %s3370_s17, %s3370_s17 }
0x130d   : > { %p3379_p0 = por %p3378_p13, %p3377_p12 }
0x130e   : > { %s4042_s7 = sadd.s32 4294967295, %s4041_s26  }
0x130f   : > { %p3959_p8 = scmp.eq.s32.totalorder %s4042_s7, 1 }
0x1311   : > { %p3372_p10 = pnand %p3371_p9, %p3959_p8 }
0x1313   : > { %p3373_p11 = pneg %p3372_p10 }
0x1315   : > { %p3380_p1 = pnand %p3379_p0, %p3373_p11 }
0x1317   : > { %3383 = shalt.err (!%p3380_p1)
}
0x1318   : > { %s4044_s18 = sld [smem:[#allocation15_spill]] }
0x131e   : > { %s3384_s15 = scalar_lea.hbm %s4044_s18, 512 }
0x131f   : > { %p3385_p2 = scmp.ne.s32.totalorder %s4044_s18, %s3384_s15  ;;  %p3390_p5 = scmp.lt.u32.totalorder %s3384_s15, %s4044_s18 }
0x1321   : > { %p3386_p3 = pnand %p3385_p2, %p3959_p8 }
0x1323   : > { %p3387_p4 = pneg %p3386_p3 }
0x1325   : > { %p3392_p6 = pnand %p3390_p5, %p3387_p4 }
0x1327   : > { %3395 = shalt.err (!%p3392_p6)
}
0x1328   : > { %s3438_s24 = smov 128   ;;  %s3439_s29 = smov 8  }
0x1329   : > { %3203 = dma.vmem_to_hbm [thread:$0]  (%p3959_p8), %s2716_s27, 512, %s4044_s18, [#allocation3], %s3438_s24, %s3438_s24, %s3439_s29  }
0x132a   : > { %3409 = dma.done.wait (%p3959_p8), [#allocation3], 512  }
0x132b   : > { %3411 = vsyncadd (%p3959_p8), [#allocation3], 4294966784 }
0x132c PF: > { %s4045_s23 = sld [smem:[#allocation6_spill]]  ;;  %s4046_s24 = sld [smem:[#allocation5_spill]] }
0x132d   : > { %s4047_s25 = sld [smem:[#allocation7_spill]] }
0x1332   : > { %s28_s26 = sadd.s32 1, %s4045_s23  }
0x1333   : > { %p25_p7 = scmp.ge.s32.totalorder %s28_s26, 4  }
0x1335   :  { %27 = sbr.rel (!%p25_p7) target bundleno = 11 (0xb), region = 161 }
0x133c   :  { %2731 = vsyncpa [#allocation3], 1 }
0x133d   :  { %2733 = vsyncpa [#allocation3 + $0x1], 1 }

</bundles_post_ra>
